<compile_context>
chip_gen: v5e
topology: v5e:2x2
jax: 0.10.0
libtpu: 0.0.40
codegen_flags: <defaults>
</compile_context>

<pallas_src>
import functools

import jax
import jax.numpy as jnp
from jax import lax
from jax.experimental import pallas as pl
from jax.experimental.pallas import tpu as pltpu

_BN_EPS = 1e-5
_NEG_BIG = -1e30
LANE = 128


def _round_up(n, m):
    return ((n + m - 1) // m) * m


def _dot_t(a, bt):
    """a: (M, K) @ bt: (N, K) -> (M, N), f32 accumulation (q @ k^T pattern)."""
    return lax.dot_general(a, bt, (((1,), (1,)), ((), ())),
                           preferred_element_type=jnp.float32)


def _vmem_limit_bytes():
    # Generation-aware VMEM budget: ~80% of physical capacity, capped for safety
    # (v5e/v6e: 128 MiB -> 100 MiB; v7x: 64 MiB -> ~51 MiB).
    try:
        cap = int(pltpu.get_tpu_info().vmem_capacity_bytes)
        return min(int(cap * 0.8), 100 * 1024 * 1024)
    except Exception:
        return 32 * 1024 * 1024


# ----------------------------------------------------------------------------
# Fused single-block kernel (grid=(), whole batch resident, single-buffered).
# ----------------------------------------------------------------------------
def modeld_fused_kernel(x_ref, w0t_ref, w1t_ref, w2_ref, bias_ref, o_ref):
    # x_ref: (B, F) f32/bf16;  w0t_ref: (H0, F) bf16 (transposed fc0 weight);
    # w1t_ref: (H1, H0) bf16 (transposed fc1);  w2_ref: (H1, NC) bf16;
    # bias_ref: (3, NC) f32 (row 2 padded with -1e30 beyond the real classes).
    x_raw = x_ref[...]
    x_f32 = x_raw.astype(jnp.float32)          # no-op when x is already f32
    x_bf = x_raw.astype(jnp.bfloat16)          # no-op when x is already bf16
    inv_b = 1.0 / x_raw.shape[0]

    # --- BatchNorm1d(F), training mode, folded into fc0 (single stats pass) ---
    mean0 = jnp.sum(x_f32, axis=0, keepdims=True) * inv_b           # (1, F)
    ex2_0 = jnp.sum(x_f32 * x_f32, axis=0, keepdims=True) * inv_b
    inv0 = lax.rsqrt(ex2_0 - mean0 * mean0 + _BN_EPS)               # (1, F)
    w0t = (w0t_ref[...].astype(jnp.float32) * inv0).astype(jnp.bfloat16)
    shift0 = _dot_t(mean0.astype(jnp.bfloat16), w0t)                # (1, H0)
    h0 = _dot_t(x_bf, w0t) + (bias_ref[0:1, :] - shift0)
    h0 = jnp.maximum(h0, 0.0)                                       # (B, H0) f32

    # --- BatchNorm1d(H0), training mode, folded into fc1 ---
    mean1 = jnp.sum(h0, axis=0, keepdims=True) * inv_b
    ex2_1 = jnp.sum(h0 * h0, axis=0, keepdims=True) * inv_b
    inv1 = lax.rsqrt(ex2_1 - mean1 * mean1 + _BN_EPS)
    w1t = (w1t_ref[...].astype(jnp.float32) * inv1).astype(jnp.bfloat16)
    shift1 = _dot_t(mean1.astype(jnp.bfloat16), w1t)
    h1 = _dot_t(h0.astype(jnp.bfloat16), w1t) + (bias_ref[1:2, :] - shift1)
    h1 = jnp.maximum(h1, 0.0)

    # --- fc2 (padded class lanes get bias -1e30) + log_softmax ---
    logits = jnp.dot(h1.astype(jnp.bfloat16), w2_ref[...],
                     preferred_element_type=jnp.float32) + bias_ref[2:3, :]
    m = jnp.max(logits, axis=-1, keepdims=True)
    z = logits - m
    lse = jnp.log(jnp.sum(jnp.exp(z), axis=-1, keepdims=True))
    o_ref[...] = (z - lse).astype(o_ref.dtype)


# ----------------------------------------------------------------------------
# Tiled 3-pass path kernels (for large batches).
# TODO(synk): per-core partial BN stats + cross-core combine (CMEM/core_barrier)
#             would let passes A/B use both v7x TensorCores; they are serial
#             ("arbitrary") here, only the tail pass is megacore-parallel.
# ----------------------------------------------------------------------------
def bn_stats_kernel(x_ref, sum_ref, sumsq_ref):
    x = x_ref[...].astype(jnp.float32)

    @pl.when(pl.program_id(0) == 0)
    def _():
        sum_ref[...] = jnp.zeros_like(sum_ref)
        sumsq_ref[...] = jnp.zeros_like(sumsq_ref)

    sum_ref[...] += jnp.sum(x, axis=0, keepdims=True)
    sumsq_ref[...] += jnp.sum(x * x, axis=0, keepdims=True)


def fc0_fold_kernel(x_ref, w0t_ref, b0_ref, h0_ref, hsum_ref, hsumsq_ref):
    # Folded-BN fc0 + ReLU on one batch tile; accumulate h0 stats on the fly.
    h = _dot_t(x_ref[...].astype(jnp.bfloat16), w0t_ref[...]) + b0_ref[...]
    h = jnp.maximum(h, 0.0)                                         # (TB, H0) f32

    @pl.when(pl.program_id(0) == 0)
    def _():
        hsum_ref[...] = jnp.zeros_like(hsum_ref)
        hsumsq_ref[...] = jnp.zeros_like(hsumsq_ref)

    hsum_ref[...] += jnp.sum(h, axis=0, keepdims=True)
    hsumsq_ref[...] += jnp.sum(h * h, axis=0, keepdims=True)
    h0_ref[...] = h.astype(h0_ref.dtype)        # stored bf16 (halves HBM traffic)


def tail_kernel(h0_ref, w1t_ref, b1_ref, w2_ref, b2_ref, o_ref):
    # Folded-BN fc1 + ReLU + fc2 + log_softmax; rows are independent.
    h1 = _dot_t(h0_ref[...], w1t_ref[...]) + b1_ref[...]
    h1 = jnp.maximum(h1, 0.0)
    logits = jnp.dot(h1.astype(jnp.bfloat16), w2_ref[...],
                     preferred_element_type=jnp.float32) + b2_ref[...]
    m = jnp.max(logits, axis=-1, keepdims=True)
    z = logits - m
    lse = jnp.log(jnp.sum(jnp.exp(z), axis=-1, keepdims=True))
    o_ref[...] = (z - lse).astype(o_ref.dtype)


# ----------------------------------------------------------------------------
# Parameter packing (one-time, outside the hot path).
# ----------------------------------------------------------------------------
def pack_params(params):
    """Transpose+pad weights to (out, in) lane multiples (bf16) and pack the
    three biases into one (3, 128) f32 array (row 2 padded with -1e30)."""
    (w0, b0), (w1, b1), (w2, b2) = params
    image_size, h0_dim = w0.shape
    h1_dim = w1.shape[1]
    n_cls = w2.shape[1]
    H0 = _round_up(h0_dim, LANE)
    H1 = _round_up(h1_dim, LANE)
    NC = _round_up(n_cls, LANE)
    assert H0 == H1 == NC == LANE, "bias packing assumes hidden dims <= 128"

    def pad_t(w, rows, cols):   # store transposed: (out, in)
        out = jnp.zeros((rows, cols), jnp.bfloat16)
        return out.at[: w.shape[1], : w.shape[0]].set(w.T.astype(jnp.bfloat16))

    w0t = pad_t(w0, H0, image_size)            # (128, 784)
    w1t = pad_t(w1, H1, H0)                    # (128, 128)
    w2p = jnp.zeros((H1, NC), jnp.bfloat16)
    w2p = w2p.at[: w2.shape[0], : w2.shape[1]].set(w2.astype(jnp.bfloat16))

    bias_pack = jnp.zeros((3, LANE), jnp.float32)
    bias_pack = bias_pack.at[0, :h0_dim].set(b0.astype(jnp.float32))
    bias_pack = bias_pack.at[1, :h1_dim].set(b1.astype(jnp.float32))
    bias_pack = bias_pack.at[2, :].set(jnp.full((LANE,), _NEG_BIG, jnp.float32))
    bias_pack = bias_pack.at[2, :n_cls].set(b2.astype(jnp.float32))
    return (w0t, w1t, w2p, bias_pack), n_cls


# ----------------------------------------------------------------------------
# Forward wrappers.
# ----------------------------------------------------------------------------
def _forward_fused(x1, w0t, w1t, w2p, bias_pack, vlim):
    B, F = x1.shape
    H0, H1, NC = w0t.shape[0], w1t.shape[0], w2p.shape[1]
    flops = 2 * B * (F * H0 + H0 * H1 + H1 * NC) + 2 * (F * H0 + H0 * H1)
    bytes_accessed = (x1.size * x1.dtype.itemsize + (w0t.size + w1t.size + w2p.size) * 2
                      + bias_pack.size * 4 + B * NC * 4)
    return pl.pallas_call(
        modeld_fused_kernel,
        out_shape=jax.ShapeDtypeStruct((B, NC), jnp.float32),
        # grid=() -> single invocation, whole arrays VMEM-resident,
        # inherently single-buffered (no 2x pipeline buffers).
        compiler_params=pltpu.CompilerParams(vmem_limit_bytes=vlim),
        cost_estimate=pl.CostEstimate(flops=flops,
                                      transcendentals=B * NC + 2 * (F + H0),
                                      bytes_accessed=bytes_accessed),
    )(x1, w0t, w1t, w2p, bias_pack)


def _forward_tiled(x1, w0t, w1t, w2p, bias_pack, vlim, tb):
    B, F = x1.shape
    H0, H1, NC = w0t.shape[0], w1t.shape[0], w2p.shape[1]
    nb = B // tb
    inv_b = 1.0 / B

    # --- pass A: per-feature sum / sum-of-squares of x over the batch -------
    sum0, sumsq0 = pl.pallas_call(
        bn_stats_kernel,
        out_shape=(jax.ShapeDtypeStruct((1, F), jnp.float32),
                   jax.ShapeDtypeStruct((1, F), jnp.float32)),
        grid=(nb,),
        in_specs=[pl.BlockSpec((tb, F), lambda i: (i, 0))],
        out_specs=(pl.BlockSpec((1, F), lambda i: (0, 0)),
                   pl.BlockSpec((1, F), lambda i: (0, 0))),
        compiler_params=pltpu.CompilerParams(
            dimension_semantics=("arbitrary",), vmem_limit_bytes=vlim),
    )(x1)

    # --- fold BN1 into fc0 (O(weights) work, once per forward) --------------
    mean0 = sum0 * inv_b
    inv0 = lax.rsqrt(sumsq0 * inv_b - mean0 * mean0 + _BN_EPS)
    w0t_fold = (w0t.astype(jnp.float32) * inv0).astype(jnp.bfloat16)
    b0_eff = bias_pack[0:1, :] - _dot_t(mean0.astype(jnp.bfloat16), w0t_fold)

    # --- pass B: folded fc0 + ReLU, h0 stats accumulated across tiles -------
    h0, hsum, hsumsq = pl.pallas_call(
        fc0_fold_kernel,
        out_shape=(jax.ShapeDtypeStruct((B, H0), jnp.bfloat16),
                   jax.ShapeDtypeStruct((1, H0), jnp.float32),
                   jax.ShapeDtypeStruct((1, H0), jnp.float32)),
        grid=(nb,),
        in_specs=[pl.BlockSpec((tb, F), lambda i: (i, 0)),
                  pl.BlockSpec((H0, F), lambda i: (0, 0)),
                  pl.BlockSpec((1, H0), lambda i: (0, 0))],
        out_specs=(pl.BlockSpec((tb, H0), lambda i: (i, 0)),
                   pl.BlockSpec((1, H0), lambda i: (0, 0)),
                   pl.BlockSpec((1, H0), lambda i: (0, 0))),
        compiler_params=pltpu.CompilerParams(
            dimension_semantics=("arbitrary",), vmem_limit_bytes=vlim),
    )(x1, w0t_fold, b0_eff)

    # --- fold BN2 into fc1 ---------------------------------------------------
    mean1 = hsum * inv_b
    inv1 = lax.rsqrt(hsumsq * inv_b - mean1 * mean1 + _BN_EPS)
    w1t_fold = (w1t.astype(jnp.float32) * inv1).astype(jnp.bfloat16)
    b1_eff = bias_pack[1:2, :] - _dot_t(mean1.astype(jnp.bfloat16), w1t_fold)

    # --- pass C: fc1 + ReLU + fc2 + log_softmax (row-independent, parallel) --
    return pl.pallas_call(
        tail_kernel,
        out_shape=jax.ShapeDtypeStruct((B, NC), jnp.float32),
        grid=(nb,),
        in_specs=[pl.BlockSpec((tb, H0), lambda i: (i, 0)),
                  pl.BlockSpec((H1, H0), lambda i: (0, 0)),
                  pl.BlockSpec((1, H1), lambda i: (0, 0)),
                  pl.BlockSpec((H1, NC), lambda i: (0, 0)),
                  pl.BlockSpec((1, NC), lambda i: (0, 0))],
        out_specs=pl.BlockSpec((tb, NC), lambda i: (i, 0)),
        compiler_params=pltpu.CompilerParams(
            dimension_semantics=("parallel",), vmem_limit_bytes=vlim),
    )(h0, w1t_fold, b1_eff, w2p, bias_pack[2:3, :])


@functools.partial(jax.jit, static_argnames=("image_size", "num_classes", "batch_tile",
                                              "force_path", "stream_x_bf16",
                                              "return_padded"))
def model_d_forward(x, packed, *, image_size, num_classes, batch_tile=256,
                    force_path=None, stream_x_bf16=False, return_padded=False):
    """x: any shape whose trailing dims flatten to image_size (e.g. NCHW)."""
    w0t, w1t, w2p, bias_pack = packed
    x1 = x.reshape(-1, image_size)
    # Optional bf16 streaming of x halves HBM traffic in the memory-bound
    # large-B regime; it slightly perturbs the BN statistics, so off by default.
    x1 = x1.astype(jnp.bfloat16 if stream_x_bf16 else jnp.float32)
    B = x1.shape[0]
    vlim = _vmem_limit_bytes()

    if force_path == "tiled":
        use_tiled = True
    elif force_path == "fused":
        use_tiled = False
    else:
        use_tiled = (B % batch_tile == 0) and (B // batch_tile >= 2)
    # TODO(synk): pad ragged batches to a tile multiple so very large batches
    #             that are not divisible by batch_tile can still take the
    #             tiled path instead of the single-block (VMEM-limited) one.

    if use_tiled:
        out_padded = _forward_tiled(x1, w0t, w1t, w2p, bias_pack, vlim, batch_tile)
    else:
        out_padded = _forward_fused(x1, w0t, w1t, w2p, bias_pack, vlim)

    if return_padded:
        return out_padded          # (B, 128); padded class lanes hold ~-1e30
    return out_padded[:, :num_classes]


# ----------------------------------------------------------------------------
# Param init + pure-JAX references.
# ----------------------------------------------------------------------------
def init_params(key, image_size):
    """nn.Linear default init: uniform +/- 1/sqrt(fan_in); stored as (in, out)."""
    dims = [image_size, 100, 50, 10]
    params = []
    for i in range(3):
        fan_in, fan_out = dims[i], dims[i + 1]
        key, kw, kb = jax.random.split(key, 3)
        bound = 1.0 / (fan_in ** 0.5)
        w = jax.random.uniform(kw, (fan_in, fan_out), jnp.float32, -bound, bound)
        b = jax.random.uniform(kb, (fan_out,), jnp.float32, -bound, bound)
        params.append((w, b))
    return params


def reference_forward_f32(x, params, image_size):
    """Original module semantics (training-mode BatchNorm), full f32 math."""
    def bn(a):
        mean = jnp.mean(a, axis=0, keepdims=True)
        c = a - mean
        var = jnp.mean(c * c, axis=0, keepdims=True)
        return c * lax.rsqrt(var + _BN_EPS)

    (w0, b0), (w1, b1), (w2, b2) = params
    x1 = bn(x.reshape(-1, image_size).astype(jnp.float32))
    h0 = bn(jax.nn.relu(x1 @ w0 + b0))
    h1 = jax.nn.relu(h0 @ w1 + b1)
    return jax.nn.log_softmax(h1 @ w2 + b2, axis=1)


def reference_forward_matched(x, packed, image_size, num_classes):
    """Pure-JAX mirror of the folded-BN bf16/f32 math used by the kernels."""
    w0t, w1t, w2p, bias_pack = packed
    x1 = x.reshape(-1, image_size).astype(jnp.float32)

    def bn_fold_linear(a, wt, b_row):
        mean = jnp.mean(a, axis=0, keepdims=True)
        var = jnp.mean(a * a, axis=0, keepdims=True) - mean * mean
        inv = lax.rsqrt(var + _BN_EPS)
        wf = (wt.astype(jnp.float32) * inv).astype(jnp.bfloat16)
        shift = _dot_t(mean.astype(jnp.bfloat16), wf)
        return _dot_t(a.astype(jnp.bfloat16), wf) + (b_row - shift)

    h0 = jax.nn.relu(bn_fold_linear(x1, w0t, bias_pack[0:1, :]))
    h1 = jax.nn.relu(bn_fold_linear(h0, w1t, bias_pack[1:2, :]))
    logits = jnp.dot(h1.astype(jnp.bfloat16), w2p,
                     preferred_element_type=jnp.float32) + bias_pack[2:3, :]
    return jax.nn.log_softmax(logits, axis=-1)[:, :num_classes]


if __name__ == "__main__":
    key = jax.random.PRNGKey(0)
    k_x, k_p, k_x2 = jax.random.split(key, 3)

    # The module hardcodes BatchNorm1d(784) => image_size must be 784 (MNIST-like).
    B, C, H, W = 8, 1, 28, 28
    image_size = C * H * W
    x_small = jax.random.normal(k_x, (B, C, H, W), jnp.float32)

    params = init_params(k_p, image_size)
    packed, num_classes = pack_params(params)

    # --- small batch: grid-less fused single-block kernel --------------------
    out_small = model_d_forward(x_small, packed, image_size=image_size,
                                num_classes=num_classes)
    out_small = jax.block_until_ready(out_small)
    assert out_small.shape == (B, 10)

    ref_small = reference_forward_matched(x_small, packed, image_size, num_classes)
    assert jnp.max(jnp.abs(out_small - ref_small)) < 2e-2, \
        "fused: mismatch vs matched-precision reference"
    ref_f32 = reference_forward_f32(x_small, params, image_size)
    assert jnp.max(jnp.abs(out_small - ref_f32)) < 2e-1, \
        "fused: mismatch vs f32 reference"
    assert jnp.max(jnp.abs(jnp.sum(jnp.exp(out_small), axis=1) - 1.0)) < 1e-4

    # --- larger batch: 3-pass tiled path (stats -> folded fc0 -> tail) -------
    B2 = 256
    x_big = jax.random.normal(k_x2, (B2, C, H, W), jnp.float32)
    out_big = model_d_forward(x_big, packed, image_size=image_size,
                              num_classes=num_classes, batch_tile=128)
    out_big = jax.block_until_ready(out_big)
    assert out_big.shape == (B2, 10)

    ref_big = reference_forward_matched(x_big, packed, image_size, num_classes)
    assert jnp.max(jnp.abs(out_big - ref_big)) < 2e-2, \
        "tiled: mismatch vs matched-precision reference"
    assert jnp.max(jnp.abs(jnp.sum(jnp.exp(out_big), axis=1) - 1.0)) < 1e-4

    print("KERNEL_OK")
</pallas_src>

<mosaic_0001>
module attributes {stable_mosaic.version = 11 : i64} {
  func.func @modeld_fused_kernel(%arg0: memref<8x784xf32, #tpu.memory_space<vmem>>, %arg1: memref<128x784xbf16, #tpu.memory_space<vmem>>, %arg2: memref<128x128xbf16, #tpu.memory_space<vmem>>, %arg3: memref<128x128xbf16, #tpu.memory_space<vmem>>, %arg4: memref<3x128xf32, #tpu.memory_space<vmem>>, %arg5: memref<8x128xf32, #tpu.memory_space<vmem>>) attributes {dimension_semantics = [], scalar_prefetch = 0 : i64, scratch_operands = 0 : i64, tpu.core_type = #tpu.core_type<tc>} {
    %c0 = arith.constant 0 : index
    %c0_0 = arith.constant 0 : index
    %0 = vector.load %arg0[%c0, %c0_0] : memref<8x784xf32, #tpu.memory_space<vmem>>, vector<8x784xf32>
    %1 = arith.truncf %0 : vector<8x784xf32> to vector<8x784xbf16>
    %cst = arith.constant dense<0.000000e+00> : vector<784xf32>
    %2 = vector.multi_reduction <add>, %0, %cst [0] : vector<8x784xf32> to vector<784xf32>
    %3 = vector.shape_cast %2 : vector<784xf32> to vector<1x784xf32>
    %cst_1 = arith.constant 1.250000e-01 : f32
    %4 = vector.broadcast %cst_1 : f32 to vector<1x784xf32>
    %5 = arith.mulf %3, %4 : vector<1x784xf32>
    %6 = arith.mulf %0, %0 : vector<8x784xf32>
    %cst_2 = arith.constant dense<0.000000e+00> : vector<784xf32>
    %7 = vector.multi_reduction <add>, %6, %cst_2 [0] : vector<8x784xf32> to vector<784xf32>
    %8 = vector.shape_cast %7 : vector<784xf32> to vector<1x784xf32>
    %cst_3 = arith.constant 1.250000e-01 : f32
    %9 = vector.broadcast %cst_3 : f32 to vector<1x784xf32>
    %10 = arith.mulf %8, %9 : vector<1x784xf32>
    %11 = arith.mulf %5, %5 : vector<1x784xf32>
    %12 = arith.subf %10, %11 : vector<1x784xf32>
    %cst_4 = arith.constant 9.99999974E-6 : f32
    %13 = vector.broadcast %cst_4 : f32 to vector<1x784xf32>
    %14 = arith.addf %12, %13 : vector<1x784xf32>
    %15 = math.rsqrt %14 : vector<1x784xf32>
    %c0_5 = arith.constant 0 : index
    %c0_6 = arith.constant 0 : index
    %16 = vector.load %arg1[%c0_5, %c0_6] : memref<128x784xbf16, #tpu.memory_space<vmem>>, vector<128x784xbf16>
    %17 = arith.extf %16 : vector<128x784xbf16> to vector<128x784xf32>
    %18 = vector.broadcast %15 : vector<1x784xf32> to vector<128x784xf32>
    %19 = arith.mulf %17, %18 : vector<128x784xf32>
    %20 = arith.truncf %19 : vector<128x784xf32> to vector<128x784xbf16>
    %21 = arith.truncf %5 : vector<1x784xf32> to vector<1x784xbf16>
    %cst_7 = arith.constant dense<0.000000e+00> : vector<1x128xf32>
    %22 = tpu.matmul %21, %20, %cst_7 {dimension_numbers = #tpu.dot_dimension_numbers<[1], [1], [0], [0], [0, 0, 1, 0], [], []>} : vector<1x784xbf16>, vector<128x784xbf16>, vector<1x128xf32> -> vector<1x128xf32>
    %cst_8 = arith.constant dense<0.000000e+00> : vector<8x128xf32>
    %23 = tpu.matmul %1, %20, %cst_8 {dimension_numbers = #tpu.dot_dimension_numbers<[1], [1], [0], [0], [0, 0, 1, 0], [], []>} : vector<8x784xbf16>, vector<128x784xbf16>, vector<8x128xf32> -> vector<8x128xf32>
    %c0_9 = arith.constant 0 : index
    %c0_10 = arith.constant 0 : index
    %24 = vector.load %arg4[%c0_9, %c0_10] : memref<3x128xf32, #tpu.memory_space<vmem>>, vector<1x128xf32>
    %25 = arith.subf %24, %22 : vector<1x128xf32>
    %26 = vector.broadcast %25 : vector<1x128xf32> to vector<8x128xf32>
    %27 = arith.addf %23, %26 : vector<8x128xf32>
    %cst_11 = arith.constant 0.000000e+00 : f32
    %28 = vector.broadcast %cst_11 : f32 to vector<8x128xf32>
    %29 = arith.maximumf %27, %28 : vector<8x128xf32>
    %cst_12 = arith.constant dense<0.000000e+00> : vector<128xf32>
    %30 = vector.multi_reduction <add>, %29, %cst_12 [0] : vector<8x128xf32> to vector<128xf32>
    %31 = vector.shape_cast %30 : vector<128xf32> to vector<1x128xf32>
    %cst_13 = arith.constant 1.250000e-01 : f32
    %32 = vector.broadcast %cst_13 : f32 to vector<1x128xf32>
    %33 = arith.mulf %31, %32 : vector<1x128xf32>
    %34 = arith.mulf %29, %29 : vector<8x128xf32>
    %cst_14 = arith.constant dense<0.000000e+00> : vector<128xf32>
    %35 = vector.multi_reduction <add>, %34, %cst_14 [0] : vector<8x128xf32> to vector<128xf32>
    %36 = vector.shape_cast %35 : vector<128xf32> to vector<1x128xf32>
    %cst_15 = arith.constant 1.250000e-01 : f32
    %37 = vector.broadcast %cst_15 : f32 to vector<1x128xf32>
    %38 = arith.mulf %36, %37 : vector<1x128xf32>
    %39 = arith.mulf %33, %33 : vector<1x128xf32>
    %40 = arith.subf %38, %39 : vector<1x128xf32>
    %cst_16 = arith.constant 9.99999974E-6 : f32
    %41 = vector.broadcast %cst_16 : f32 to vector<1x128xf32>
    %42 = arith.addf %40, %41 : vector<1x128xf32>
    %43 = math.rsqrt %42 : vector<1x128xf32>
    %c0_17 = arith.constant 0 : index
    %c0_18 = arith.constant 0 : index
    %44 = vector.load %arg2[%c0_17, %c0_18] : memref<128x128xbf16, #tpu.memory_space<vmem>>, vector<128x128xbf16>
    %45 = arith.extf %44 : vector<128x128xbf16> to vector<128x128xf32>
    %46 = vector.broadcast %43 : vector<1x128xf32> to vector<128x128xf32>
    %47 = arith.mulf %45, %46 : vector<128x128xf32>
    %48 = arith.truncf %47 : vector<128x128xf32> to vector<128x128xbf16>
    %49 = arith.truncf %33 : vector<1x128xf32> to vector<1x128xbf16>
    %cst_19 = arith.constant dense<0.000000e+00> : vector<1x128xf32>
    %50 = tpu.matmul %49, %48, %cst_19 {dimension_numbers = #tpu.dot_dimension_numbers<[1], [1], [0], [0], [0, 0, 1, 0], [], []>} : vector<1x128xbf16>, vector<128x128xbf16>, vector<1x128xf32> -> vector<1x128xf32>
    %51 = arith.truncf %29 : vector<8x128xf32> to vector<8x128xbf16>
    %cst_20 = arith.constant dense<0.000000e+00> : vector<8x128xf32>
    %52 = tpu.matmul %51, %48, %cst_20 {dimension_numbers = #tpu.dot_dimension_numbers<[1], [1], [0], [0], [0, 0, 1, 0], [], []>} : vector<8x128xbf16>, vector<128x128xbf16>, vector<8x128xf32> -> vector<8x128xf32>
    %c1 = arith.constant 1 : index
    %c0_21 = arith.constant 0 : index
    %53 = vector.load %arg4[%c1, %c0_21] : memref<3x128xf32, #tpu.memory_space<vmem>>, vector<1x128xf32>
    %54 = arith.subf %53, %50 : vector<1x128xf32>
    %55 = vector.broadcast %54 : vector<1x128xf32> to vector<8x128xf32>
    %56 = arith.addf %52, %55 : vector<8x128xf32>
    %cst_22 = arith.constant 0.000000e+00 : f32
    %57 = vector.broadcast %cst_22 : f32 to vector<8x128xf32>
    %58 = arith.maximumf %56, %57 : vector<8x128xf32>
    %59 = arith.truncf %58 : vector<8x128xf32> to vector<8x128xbf16>
    %c0_23 = arith.constant 0 : index
    %c0_24 = arith.constant 0 : index
    %60 = vector.load %arg3[%c0_23, %c0_24] : memref<128x128xbf16, #tpu.memory_space<vmem>>, vector<128x128xbf16>
    %cst_25 = arith.constant dense<0.000000e+00> : vector<8x128xf32>
    %61 = tpu.matmul %59, %60, %cst_25 {dimension_numbers = #tpu.dot_dimension_numbers<[1], [0], [0], [1], [0, 0, 1, 1], [], []>} : vector<8x128xbf16>, vector<128x128xbf16>, vector<8x128xf32> -> vector<8x128xf32>
    %c2 = arith.constant 2 : index
    %c0_26 = arith.constant 0 : index
    %62 = vector.load %arg4[%c2, %c0_26] : memref<3x128xf32, #tpu.memory_space<vmem>>, vector<1x128xf32>
    %63 = vector.broadcast %62 : vector<1x128xf32> to vector<8x128xf32>
    %64 = arith.addf %61, %63 : vector<8x128xf32>
    %cst_27 = arith.constant dense<0xFF800000> : vector<8xf32>
    %65 = vector.multi_reduction <maximumf>, %64, %cst_27 [1] : vector<8x128xf32> to vector<8xf32>
    %66 = vector.shape_cast %65 : vector<8xf32> to vector<8x1xf32>
    %67 = vector.broadcast %66 : vector<8x1xf32> to vector<8x128xf32>
    %68 = arith.subf %64, %67 : vector<8x128xf32>
    %69 = math.exp %68 : vector<8x128xf32>
    %cst_28 = arith.constant dense<0.000000e+00> : vector<8xf32>
    %70 = vector.multi_reduction <add>, %69, %cst_28 [1] : vector<8x128xf32> to vector<8xf32>
    %71 = vector.shape_cast %70 : vector<8xf32> to vector<8x1xf32>
    %72 = math.log %71 : vector<8x1xf32>
    %73 = vector.broadcast %72 : vector<8x1xf32> to vector<8x128xf32>
    %74 = arith.subf %68, %73 : vector<8x128xf32>
    %c0_29 = arith.constant 0 : index
    %c0_30 = arith.constant 0 : index
    %75 = vector.load %arg5[%c0_29, %c0_30] : memref<8x128xf32, #tpu.memory_space<vmem>>, vector<8x128xf32>
    tpu.vector_store %arg5[%c0_29, %c0_30], %74 {strides = array<i32>} : memref<8x128xf32, #tpu.memory_space<vmem>>, vector<8x128xf32>,
    return
  }
}

</mosaic_0001>

<bundles_post_ra>
// kernel: model_d_forward.1
= control target key start
LH: loop header
LB: loop body
LE: loop exit
PB: predicated region body
PF: predicated region fallthrough
CT: control target
= control target key end

     0   :  { %s1964_s0 = inlined_call_operand.vmem [shape: f32[8,784], index: 0, kind: input, shape index: {}]   ;;  %s1965_s1 = inlined_call_operand.vmem [shape: bf16[128,784], index: 1, kind: input, shape index: {}]   ;;  %s1966_s2 = inlined_call_operand.vmem [shape: bf16[128,128], index: 2, kind: input, shape index: {}]   ;;  %s1967_s3 = inlined_call_operand.vmem [shape: bf16[128,128], index: 3, kind: input, shape index: {}]   ;;  %s1968_s4 = inlined_call_operand.vmem [shape: f32[3,128], index: 4, kind: input, shape index: {}]   ;;  %s1969_s5 = inlined_call_operand.hbm [shape: f32[8,128], index: 5, kind: output, shape index: {}]  }
   0x1   :  { %v21_v0 = vld [vmem:[%s1964_s0] sm:$0xff]  ;;  %v22_v1 = vld [vmem:[%s1964_s0 + $0x8] sm:$0xff]  ;;  %v23_v2 = vld [vmem:[%s1964_s0 + $0x10] sm:$0xff] }
   0x2   :  { %v35_v3 = vrot.slane %v21_v0, 4  ;;  %v86_v4 = vmul.f32 %v21_v0, %v21_v0  ;;  %v41_v5 = vrot.slane %v22_v1, 4  ;;  %v87_v6 = vmul.f32 %v22_v1, %v22_v1  ;;  %v24_v7 = vld [vmem:[%s1964_s0 + $0x18] sm:$0xff] }
   0x3   :  { %v47_v8 = vrot.slane %v23_v2, 4  ;;  %v88_v9 = vmul.f32 %v23_v2, %v23_v2  ;;  %v53_v10 = vrot.slane %v24_v7, 4  ;;  %v89_v11 = vmul.f32 %v24_v7, %v24_v7 }
   0x4   :  { %10 = vsyncpa [#allocation3], 0  ;;  %v36_v12 = vadd.f32 %v35_v3, %v21_v0  ;;  %v93_v13 = vrot.slane %v86_v4, 4  ;;  %v42_v14 = vadd.f32 %v41_v5, %v22_v1  ;;  %v99_v15 = vrot.slane %v87_v6, 4  ;;  %s1015_s29 = sshll.u32 %s1969_s5, 4  ;;  %s1016_s29 = int_to_ptr.hbm [resolvable:$true] %s1015_s29 }
   0x5   :  { %v48_v16 = vadd.f32 %v47_v8, %v23_v2  ;;  %v105_v17 = vrot.slane %v88_v9, 4  ;;  %v54_v22 = vadd.f32 %v53_v10, %v24_v7  ;;  %v111_v23 = vrot.slane %v89_v11, 4 }
   0x6   :  { %v37_v18 = vrot.slane %v36_v12, 2  ;;  %v94_v19 = vadd.f32 %v93_v13, %v86_v4  ;;  %v43_v20 = vrot.slane %v42_v14, 2  ;;  %v100_v21 = vadd.f32 %v99_v15, %v87_v6  ;;  %v294_v13 = vld [vmem:[%s1965_s1 + $0x1a4] sm:$0xff] }
   0x7   :  { %v49_v26 = vrot.slane %v48_v16, 2  ;;  %v106_v27 = vadd.f32 %v105_v17, %v88_v9  ;;  %v55_v36 = vrot.slane %v54_v22, 2  ;;  %v112_v37 = vadd.f32 %v111_v23, %v89_v11  ;;  %v1228_v17 = vld [vmem:[%s1965_s1 + $0x190] sm:$0xff] }
   0x8   :  { %v38_v24 = vadd.f32 %v37_v18, %v36_v12  ;;  %v95_v25 = vrot.slane %v94_v19, 2  ;;  %v44_v28 = vadd.f32 %v43_v20, %v42_v14  ;;  %v101_v29 = vrot.slane %v100_v21, 2  ;;  %v290_v12 = vld [vmem:[%s1965_s1 + $0x188] sm:$0xff] }
   0x9   :  { %v50_v32 = vadd.f32 %v49_v26, %v48_v16  ;;  %v107_v33 = vrot.slane %v106_v27, 2  ;;  %v56_v44 = vadd.f32 %v55_v36, %v54_v22  ;;  %v113_v45 = vrot.slane %v112_v37, 2  ;;  %v1233_v18 = vld [vmem:[%s1965_s1 + $0x1ac] sm:$0xff] }
   0xa   :  { %v39_v30 = vrot.slane %v38_v24, 1  ;;  %v96_v31 = vadd.f32 %v95_v25, %v94_v19  ;;  %v45_v34 = vrot.slane %v44_v28, 1  ;;  %v102_v35 = vadd.f32 %v101_v29, %v100_v21 }
   0xb   :  { %v51_v40 = vrot.slane %v50_v32, 1  ;;  %v108_v41 = vadd.f32 %v107_v33, %v106_v27  ;;  %v57_v52 = vrot.slane %v56_v44, 1  ;;  %v114_v53 = vadd.f32 %v113_v45, %v112_v37  ;;  %v286_v37 = vld [vmem:[%s1965_s1 + $0x16c] sm:$0xff]  ;;  %v283_v45 = vld [vmem:[%s1965_s1 + $0x158] sm:$0xff] }
   0xc   :  { %v40_v38 = vadd.f32 %v39_v30, %v38_v24  ;;  %v97_v39 = vrot.slane %v96_v31, 1  ;;  %v46_v42 = vadd.f32 %v45_v34, %v44_v28  ;;  %v103_v43 = vrot.slane %v102_v35, 1  ;;  %v282_v34 = vld [vmem:[%s1965_s1 + $0x150] sm:$0xff] }
   0xd   :  { %v52_v48 = vadd.f32 %v51_v40, %v50_v32  ;;  %v109_v49 = vrot.slane %v108_v41, 1  ;;  %v58_v60 = vadd.f32 %v57_v52, %v56_v44  ;;  %v115_v61 = vrot.slane %v114_v53, 1 }
   0xe   :  { %v1200_v46 = vmul.f32 0.125, %v40_v38  ;;  %v98_v47 = vadd.f32 %v97_v39, %v96_v31  ;;  %v1202_v50 = vmul.f32 0.125, %v46_v42  ;;  %v104_v51 = vadd.f32 %v103_v43, %v102_v35 }
   0xf   :  { %v1206_v56 = vmul.f32 0.125, %v52_v48  ;;  %v110_v57 = vadd.f32 %v109_v49, %v108_v41  ;;  %v1212_v2 = vmul.f32 0.125, %v58_v60  ;;  %v116_v3 = vadd.f32 %v115_v61, %v114_v53  ;;  %v270_v48 = vld [vmem:[%s1965_s1 + $0xfc] sm:$0xff] }
  0x10   :  { %v136_v54 = vmul.f32 0.125, %v98_v47  ;;  %v143_v55 = vmul.f32 %v1200_v46, %v1200_v46  ;;  %v137_v58 = vmul.f32 0.125, %v104_v51  ;;  %v144_v59 = vmul.f32 %v1202_v50, %v1202_v50 }
  0x11   :  { %v138_v63 = vmul.f32 0.125, %v110_v57  ;;  %v145_v0 = vmul.f32 %v1206_v56, %v1206_v56  ;;  %v139_v7 = vmul.f32 0.125, %v116_v3  ;;  %v146_v8 = vmul.f32 %v1212_v2, %v1212_v2 }
  0x12   :  { %v150_v62 = vsub.f32 %v136_v54, %v143_v55  ;;  %v151_v1 = vsub.f32 %v137_v58, %v144_v59  ;;  %v396_v20 = vunpack.c.l.bf16 %v290_v12  ;;  %v403_v21 = vunpack.c.l.bf16 %v294_v13  ;;  %v287_v55 = vld [vmem:[%s1965_s1 + $0x174] sm:$0xff] }
  0x13   :  { %v152_v5 = vsub.f32 %v138_v63, %v145_v0  ;;  %v153_v10 = vsub.f32 %v139_v7, %v146_v8  ;;  %v397_v24 = vunpack.c.h.bf16 %v290_v12  ;;  %v404_v25 = vunpack.c.h.bf16 %v294_v13 }
  0x14   :  { %v157_v4 = vadd.f32 1e-05, %v150_v62  ;;  %v158_v6 = vadd.f32 1e-05, %v151_v1  ;;  %v398_v28 = vunpack.c.l.bf16 %v1228_v17  ;;  %v405_v29 = vunpack.c.l.bf16 %v1233_v18 }
  0x15   :  { %v159_v9 = vadd.f32 1e-05, %v152_v5  ;;  %v1216_v11 = vadd.f32 1e-05, %v153_v10  ;;  %v399_v30 = vunpack.c.h.bf16 %v1228_v17  ;;  %v406_v43 = vunpack.c.h.bf16 %v1233_v18  ;;  %v274_v17 = vld [vmem:[%s1965_s1 + $0x118] sm:$0xff] }
  0x16   :  { %1107 = vrsqrt.f32 %v157_v4  ;;  %vm170_vm0 = vweird.f32 %v157_v4  ;;  %vm180_vm2 = vweird.f32 %v158_v6  ;;  %v382_v44 = vunpack.c.l.bf16 %v282_v34 }
  0x17   :  { %1109 = vrsqrt.f32 %v158_v6  ;;  %vm190_vm4 = vweird.f32 %v159_v9  ;;  %v389_v51 = vunpack.c.l.bf16 %v286_v37  ;;  %v383_v52 = vunpack.c.h.bf16 %v282_v34 }
  0x18   :  { %1111 = vrsqrt.f32 %v159_v9  ;;  %vm200_vm9 = vweird.f32 %v1216_v11  ;;  %v390_v59 = vunpack.c.h.bf16 %v286_v37  ;;  %v384_v60 = vunpack.c.l.bf16 %v283_v45 }
  0x19   :  { %1113 = vrsqrt.f32 %v1216_v11  ;;  %v391_v5 = vunpack.c.l.bf16 %v287_v55  ;;  %v392_v12 = vunpack.c.h.bf16 %v287_v55  ;;  %vm71_vm12 = vcmask 130048  }
  0x1c   :  { %v1108_v14 = vpop.eup %1107 }
  0x1d   :  { %v1110_v15 = vpop.eup %1109  ;;  %v165_v16 = vmul.f32 %v1108_v14, %v157_v4  ;;  %vm171_vm1 = vweird.f32 %v1108_v14 }
  0x1e   :  { %v1112_v19 = vpop.eup %1111  ;;  %v175_v22 = vmul.f32 %v1110_v15, %v158_v6  ;;  %vm181_vm3 = vweird.f32 %v1110_v15  ;;  %vm1245_vm6 = vmor %vm170_vm0, %vm171_vm1 }
  0x1f   :  { %v166_v23 = vmul.f32 %v1108_v14, %v165_v16  ;;  %v185_v26 = vmul.f32 %v1112_v19, %v159_v9  ;;  %v1114_v31 = vpop.eup %1113  ;;  %vm191_vm5 = vweird.f32 %v1112_v19  ;;  %vm1254_vm7 = vmor %vm180_vm2, %vm181_vm3 }
  0x20   :  { %v176_v27 = vmul.f32 %v1110_v15, %v175_v22  ;;  %v195_v36 = vmul.f32 %v1114_v31, %v1216_v11  ;;  %vm192_vm8 = vmor %vm190_vm4, %vm191_vm5  ;;  %vm201_vm10 = vweird.f32 %v1114_v31  ;;  %v385_v11 = vunpack.c.h.bf16 %v283_v45  ;;  %v278_v22 = vld [vmem:[%s1965_s1 + $0x134] sm:$0xff] }
  0x21   :  { %v167_v32 = vmul.f32 0.5, %v166_v23  ;;  %v186_v33 = vmul.f32 %v1112_v19, %v185_v26  ;;  %vm202_vm11 = vmor %vm200_vm9, %vm201_vm10 }
  0x22   :  { %v177_v35 = vmul.f32 0.5, %v176_v27  ;;  %v196_v42 = vmul.f32 %v1114_v31, %v195_v36  ;;  %v368_v27 = vunpack.c.l.bf16 %v274_v17 }
  0x23   :  { %v168_v38 = vsub.f32 1.5, %v167_v32  ;;  %v187_v39 = vmul.f32 0.5, %v186_v33  ;;  %v369_v32 = vunpack.c.h.bf16 %v274_v17  ;;  %v376_v33 = vunpack.c.h.bf16 %v278_v22 }
  0x24   :  { %v178_v41 = vsub.f32 1.5, %v177_v35  ;;  %v197_v54 = vmul.f32 0.5, %v196_v42  ;;  %v266_v42 = vld [vmem:[%s1965_s1 + $0xe0] sm:$0xff] }
  0x25   :  { %v169_v47 = vmul.f32 %v1108_v14, %v168_v38  ;;  %v188_v49 = vsub.f32 1.5, %v187_v39 }
  0x26   :  { %v179_v53 = vmul.f32 %v1110_v15, %v178_v41  ;;  %v198_v0 = vsub.f32 1.5, %v197_v54  ;;  %v271_v54 = vld [vmem:[%s1965_s1 + $0x104] sm:$0xff] }
  0x27   :  { %v1264_v57 = vsel %vm1245_vm6, %v1108_v14, %v169_v47  ;;  %v189_v58 = vmul.f32 %v1112_v19, %v188_v49  ;;  %v267_v49 = vld [vmem:[%s1965_s1 + $0xe8] sm:$0xff]  ;;  %v364_v17 = vunpack.c.h.bf16 %v271_v54 }
  0x28   :  { %v508_v61 = vmul.f32 %v396_v20, %v1264_v57  ;;  %v515_v62 = vmul.f32 %v403_v21, %v1264_v57  ;;  %v1270_v63 = vsel %vm1254_vm7, %v1110_v15, %v179_v53  ;;  %v199_v9 = vmul.f32 %v1114_v31, %v198_v0 }
  0x29   :  { %v509_v1 = vmul.f32 %v397_v24, %v1270_v63  ;;  %v516_v3 = vmul.f32 %v404_v25, %v1270_v63  ;;  %v1274_v4 = vsel %vm192_vm8, %v1112_v19, %v189_v58  ;;  %v494_v15 = vmul.f32 %v382_v44, %v1264_v57  ;;  %v1306_v25 = vld [vmem:[%s1964_s0 + $0x20] sm:$0xff] }
  0x2a   :  { %v1276_v6 = vpack.c.bf16 %v515_v62, %v508_v61  ;;  %v510_v7 = vmul.f32 %v398_v28, %v1274_v4  ;;  %v517_v8 = vmul.f32 %v405_v29, %v1274_v4  ;;  %v1285_v14 = vsel %vm202_vm11, %v1114_v31, %v199_v9  ;;  %1984 = vst [vmem:[#allocation5_spill] sm:$0xff] %v1306_v25  ;;  %v275_v28 = vld [vmem:[%s1965_s1 + $0x120] sm:$0xff] }
  0x2b   :  { %v1280_v10 = vpack.c.bf16 %v516_v3, %v509_v1  ;;  %v501_v16 = vmul.f32 %v389_v51, %v1264_v57  ;;  %v511_v18 = vmul.f32 %v399_v30, %v1285_v14  ;;  %v518_v19 = vmul.f32 %v406_v43, %v1285_v14  ;;  %v279_v29 = vld [vmem:[%s1965_s1 + $0x13c] sm:$0xff] }
  0x2c   :  { %612 = vmatpush.bf16.xpose.msra.mxu0 %v1276_v6  ;;  %v1283_v13 = vpack.c.bf16 %v517_v8, %v510_v7  ;;  %v495_v20 = vmul.f32 %v383_v52, %v1270_v63  ;;  %v502_v21 = vmul.f32 %v390_v59, %v1270_v63  ;;  %v496_v23 = vmul.f32 %v384_v60, %v1274_v4 }
  0x2d   :  { %625 = vmatpush.bf16.xpose.msra.mxu1 %v1280_v10  ;;  %v503_v24 = vmul.f32 %v391_v5, %v1274_v4  ;;  %v1308_v26 = vpack.c.bf16 %v518_v19, %v511_v18  ;;  %v1316_v30 = vpack.c.bf16 %v501_v16, %v494_v15  ;;  %v375_v31 = vunpack.c.l.bf16 %v278_v22  ;;  %v258_v15 = vld [vmem:[%s1965_s1 + $0xa8] sm:$0xff]  ;;  %v259_v19 = vld [vmem:[%s1965_s1 + $0xb0] sm:$0xff] }
  0x2e   :  { %638 = vmatpush.bf16.xpose.msra.mxu2 %v1283_v13  ;;  %v1319_v34 = vpack.c.bf16 %v502_v21, %v495_v20  ;;  %v497_v35 = vmul.f32 %v385_v11, %v1285_v14  ;;  %v504_v36 = vmul.f32 %v392_v12, %v1285_v14  ;;  %v59_v37 = vrot.slane %v1306_v25, 4  ;;  %v262_v18 = vld [vmem:[%s1965_s1 + $0xc4] sm:$0xff] }
  0x2f   :  { %651 = vmatpush.bf16.xpose.msra.mxu3 %v1308_v26  ;;  %v1324_v38 = vpack.c.bf16 %v503_v24, %v496_v23  ;;  %v370_v39 = vunpack.c.l.bf16 %v275_v28  ;;  %v377_v40 = vunpack.c.l.bf16 %v279_v29  ;;  %v90_v41 = vmul.f32 %v1306_v25, %v1306_v25 }
  0x30   :  { %v480_v43 = vmul.f32 %v368_v27, %v1264_v57  ;;  %v487_v44 = vmul.f32 %v375_v31, %v1264_v57  ;;  %v371_v45 = vunpack.c.h.bf16 %v275_v28  ;;  %v378_v47 = vunpack.c.h.bf16 %v279_v29  ;;  %v263_v28 = vld [vmem:[%s1965_s1 + $0xcc] sm:$0xff] }
  0x31   :  { %v1341_v51 = vpack.c.bf16 %v504_v36, %v497_v35  ;;  %v481_v52 = vmul.f32 %v369_v32, %v1270_v63  ;;  %v488_v53 = vmul.f32 %v376_v33, %v1270_v63  ;;  %v60_v55 = vadd.f32 %v59_v37, %v1306_v25  ;;  %v250_v35 = vld [vmem:[%s1965_s1 + $0x70] sm:$0xff] }
  0x32   :  { %v482_v58 = vmul.f32 %v370_v39, %v1274_v4  ;;  %v489_v59 = vmul.f32 %v377_v40, %v1274_v4  ;;  %v354_v60 = vunpack.c.l.bf16 %v266_v42  ;;  %v117_v61 = vrot.slane %v90_v41, 4  ;;  %v254_v36 = vld [vmem:[%s1965_s1 + $0x8c] sm:$0xff] }
  0x33   :  { %v361_v62 = vunpack.c.l.bf16 %v270_v48  ;;  %v355_v0 = vunpack.c.h.bf16 %v266_v42  ;;  %v362_v1 = vunpack.c.h.bf16 %v270_v48  ;;  %v356_v3 = vunpack.c.l.bf16 %v267_v49 }
  0x34   :  { %613 = vmatpush.bf16.xpose.msra.mxu0 %v1316_v30  ;;  %v1352_v5 = vpack.c.bf16 %v487_v44, %v480_v43  ;;  %v483_v7 = vmul.f32 %v371_v45, %v1285_v14  ;;  %v490_v8 = vmul.f32 %v378_v47, %v1285_v14  ;;  %v363_v9 = vunpack.c.l.bf16 %v271_v54 }
  0x35   :  { %626 = vmatpush.bf16.xpose.msra.mxu1 %v1319_v34  ;;  %v1357_v11 = vpack.c.bf16 %v488_v53, %v481_v52  ;;  %v357_v12 = vunpack.c.h.bf16 %v267_v49  ;;  %v1362_v16 = vpack.c.bf16 %v489_v59, %v482_v58  ;;  %v61_v20 = vrot.slane %v60_v55, 2 }
  0x36   :  { %639 = vmatpush.bf16.xpose.msra.mxu2 %v1324_v38  ;;  %v1370_v21 = vadd.f32 %v117_v61, %v90_v41  ;;  %v466_v22 = vmul.f32 %v354_v60, %v1264_v57  ;;  %v473_v23 = vmul.f32 %v361_v62, %v1264_v57  ;;  %v467_v24 = vmul.f32 %v355_v0, %v1270_v63  ;;  %v251_v60 = vld [vmem:[%s1965_s1 + $0x78] sm:$0xff] }
  0x37   :  { %652 = vmatpush.bf16.xpose.msra.mxu3 %v1341_v51  ;;  %v474_v27 = vmul.f32 %v362_v1, %v1270_v63  ;;  %v1380_v29 = vpack.c.bf16 %v490_v8, %v483_v7  ;;  %v468_v31 = vmul.f32 %v356_v3, %v1274_v4  ;;  %v475_v32 = vmul.f32 %v363_v9, %v1274_v4  ;;  %v255_v1 = vld [vmem:[%s1965_s1 + $0x94] sm:$0xff]  ;;  %v1415_v3 = vld [vmem:[%s1964_s0 + $0x28] sm:$0xff] }
  0x38   :  { %v340_v33 = vunpack.c.l.bf16 %v258_v15  ;;  %v347_v37 = vunpack.c.l.bf16 %v262_v18  ;;  %v341_v39 = vunpack.c.h.bf16 %v258_v15  ;;  %v348_v40 = vunpack.c.h.bf16 %v262_v18  ;;  %1985 = vst [vmem:[#allocation6_spill] sm:$0xff] %v1415_v3 }
  0x39   :  { %v342_v41 = vunpack.c.l.bf16 %v259_v19  ;;  %v349_v42 = vunpack.c.l.bf16 %v263_v28  ;;  %v343_v43 = vunpack.c.h.bf16 %v259_v19  ;;  %v350_v44 = vunpack.c.h.bf16 %v263_v28 }
  0x3a   :  { %v62_v45 = vadd.f32 %v61_v20, %v60_v55  ;;  %v1392_v47 = vpack.c.bf16 %v473_v23, %v466_v22  ;;  %v469_v48 = vmul.f32 %v357_v12, %v1285_v14  ;;  %v326_v49 = vunpack.c.l.bf16 %v250_v35 }
  0x3b   :  { %v333_v52 = vunpack.c.l.bf16 %v254_v36  ;;  %v1395_v53 = vpack.c.bf16 %v474_v27, %v467_v24  ;;  %v1397_v54 = vpack.c.bf16 %v475_v32, %v468_v31  ;;  %v476_v58 = vmul.f32 %v364_v17, %v1285_v14 }
  0x3c   :  { %614 = vmatpush.bf16.xpose.msra.mxu0 %v1352_v5  ;;  %v452_v59 = vmul.f32 %v340_v33, %v1264_v57  ;;  %v459_v55 = vmul.f32 %v347_v37, %v1264_v57  ;;  %v453_v61 = vmul.f32 %v341_v39, %v1270_v63  ;;  %v460_v62 = vmul.f32 %v348_v40, %v1270_v63  ;;  %v242_v37 = vld [vmem:[%s1965_s1 + $0x38] sm:$0xff] }
  0x3d   :  { %627 = vmatpush.bf16.xpose.msra.mxu1 %v1357_v11  ;;  %v454_v0 = vmul.f32 %v342_v41, %v1274_v4  ;;  %v461_v7 = vmul.f32 %v349_v42, %v1274_v4  ;;  %v455_v8 = vmul.f32 %v343_v43, %v1285_v14  ;;  %v462_v9 = vmul.f32 %v350_v44, %v1285_v14  ;;  %v246_v43 = vld [vmem:[%s1965_s1 + $0x54] sm:$0xff] }
  0x3e   :  { %640 = vmatpush.bf16.xpose.msra.mxu2 %v1362_v16  ;;  %v327_v12 = vunpack.c.h.bf16 %v250_v35  ;;  %v438_v15 = vmul.f32 %v326_v49, %v1264_v57  ;;  %v445_v17 = vmul.f32 %v333_v52, %v1264_v57  ;;  %v334_v18 = vunpack.c.h.bf16 %v254_v36 }
  0x3f   :  { %653 = vmatpush.bf16.xpose.msra.mxu3 %v1380_v29  ;;  %v328_v19 = vunpack.c.l.bf16 %v251_v60  ;;  %v335_v20 = vunpack.c.l.bf16 %v255_v1  ;;  %v329_v22 = vunpack.c.h.bf16 %v251_v60  ;;  %v336_v23 = vunpack.c.h.bf16 %v255_v1 }
  0x40   :  { %v65_v24 = vrot.slane %v1415_v3, 4  ;;  %v1425_v27 = vpack.c.bf16 %v476_v58, %v469_v48  ;;  %v1427_v28 = vpack.c.bf16 %v459_v55, %v452_v59  ;;  %v1429_v31 = vpack.c.bf16 %v460_v62, %v453_v61  ;;  %v1453_v48 = vld [vmem:[%s1964_s0 + $0x30] sm:$0xff] }
  0x41   :  { %v91_v32 = vmul.f32 %v1415_v3, %v1415_v3  ;;  %v1434_v33 = vpack.c.bf16 %v461_v7, %v454_v0  ;;  %v1436_v35 = vpack.c.bf16 %v462_v9, %v455_v8  ;;  %v439_v36 = vmul.f32 %v327_v12, %v1270_v63  ;;  %1987 = vst [vmem:[#allocation8_spill] sm:$0xff] %v1453_v48 }
  0x42   :  { %v63_v39 = vrot.slane %v62_v45, 1  ;;  %v1442_v40 = vpack.c.bf16 %v445_v17, %v438_v15  ;;  %v446_v41 = vmul.f32 %v334_v18, %v1270_v63  ;;  %v440_v42 = vmul.f32 %v328_v19, %v1274_v4  ;;  %v243_v19 = vld [vmem:[%s1965_s1 + $0x40] sm:$0xff] }
  0x43   :  { %1986 = vst [vmem:[#allocation7_spill] sm:$0xff] %v1436_v35  ;;  %v119_v44 = vrot.slane %v1370_v21, 2  ;;  %v447_v49 = vmul.f32 %v335_v20, %v1274_v4  ;;  %v441_v52 = vmul.f32 %v329_v22, %v1285_v14  ;;  %v448_v58 = vmul.f32 %v336_v23, %v1285_v14  ;;  %v247_v20 = vld [vmem:[%s1965_s1 + $0x5c] sm:$0xff] }
  0x44   :  { %615 = vmatpush.bf16.xpose.msra.mxu0 %v1392_v47  ;;  %v64_v59 = vadd.f32 %v63_v39, %v62_v45  ;;  %v312_v60 = vunpack.c.l.bf16 %v242_v37  ;;  %v66_v61 = vadd.f32 %v65_v24, %v1415_v3  ;;  %v123_v62 = vrot.slane %v91_v32, 4 }
  0x45   :  { %628 = vmatpush.bf16.xpose.msra.mxu1 %v1395_v53  ;;  %v120_v55 = vadd.f32 %v119_v44, %v1370_v21  ;;  %v319_v0 = vunpack.c.l.bf16 %v246_v43  ;;  %v92_v7 = vmul.f32 %v1453_v48, %v1453_v48  ;;  %v1465_v8 = vpack.c.bf16 %v446_v41, %v439_v36 }
  0x46   :  { %641 = vmatpush.bf16.xpose.msra.mxu2 %v1397_v54  ;;  %v1461_v1 = vmul.f32 0.125, %v64_v59  ;;  %v67_v12 = vrot.slane %v66_v61, 2  ;;  %v124_v45 = vadd.f32 %v123_v62, %v91_v32  ;;  %v1468_v15 = vpack.c.bf16 %v447_v49, %v440_v42 }
  0x47   :  { %654 = vmatpush.bf16.xpose.msra.mxu3 %v1425_v27  ;;  %1988 = vst [vmem:[#allocation9_spill] sm:$0xff] %v1465_v8  ;;  %v121_v9 = vrot.slane %v120_v55, 1  ;;  %v72_v17 = vsel %vm71_vm12, %v1453_v48, 0.0  ;;  %v129_v18 = vsel %vm71_vm12, %v92_v7, 0.0  ;;  %v1483_v36 = vpack.c.bf16 %v448_v58, %v441_v52 }
  0x48   :  { %1989 = vst [vmem:[#allocation10_spill] sm:$0xff] %v1468_v15  ;;  %v147_v21 = vmul.f32 %v1461_v1, %v1461_v1  ;;  %v68_v23 = vadd.f32 %v67_v12, %v66_v61  ;;  %v125_v24 = vrot.slane %v124_v45, 2  ;;  %v73_v32 = vrot.slane %v72_v17, 4 }
  0x49   :  { %v122_v22 = vadd.f32 %v121_v9, %v120_v55  ;;  %v313_v39 = vunpack.c.h.bf16 %v242_v37  ;;  %v320_v41 = vunpack.c.h.bf16 %v246_v43  ;;  %v130_v42 = vrot.slane %v129_v18, 4 }
  0x4a   :  { %v69_v49 = vrot.slane %v68_v23, 1  ;;  %v126_v59 = vadd.f32 %v125_v24, %v124_v45  ;;  %v74_v62 = vadd.f32 %v73_v32, %v72_v17  ;;  %v424_v7 = vmul.f32 %v312_v60, %v1264_v57  ;;  %v238_v24 = vld [vmem:[%s1965_s1 + $0x1c] sm:$0xff] }
  0x4b   :  { %v140_v44 = vmul.f32 0.125, %v122_v22  ;;  %v314_v48 = vunpack.c.l.bf16 %v243_v19  ;;  %v321_v3 = vunpack.c.l.bf16 %v247_v20  ;;  %v131_v25 = vadd.f32 %v130_v42, %v129_v18 }
  0x4c   :  { %616 = vmatpush.bf16.xpose.msra.mxu0 %v1427_v28  ;;  %v70_v61 = vadd.f32 %v69_v49, %v68_v23  ;;  %v127_v9 = vrot.slane %v126_v59, 1  ;;  %v75_v12 = vrot.slane %v74_v62, 2  ;;  %v431_v52 = vmul.f32 %v319_v0, %v1264_v57  ;;  %v234_v0 = vld [vmem:[%s1965_s1] sm:$0xff] }
  0x4d   :  { %629 = vmatpush.bf16.xpose.msra.mxu1 %v1429_v31  ;;  %v154_v55 = vsub.f32 %v140_v44, %v147_v21  ;;  %v425_v37 = vmul.f32 %v313_v39, %v1270_v63  ;;  %v432_v43 = vmul.f32 %v320_v41, %v1270_v63  ;;  %v132_v58 = vrot.slane %v131_v25, 2 }
  0x4e   :  { %642 = vmatpush.bf16.xpose.msra.mxu2 %v1434_v33  ;;  %v1492_v17 = vmul.f32 0.125, %v70_v61  ;;  %v128_v60 = vadd.f32 %v127_v9, %v126_v59  ;;  %v76_v22 = vadd.f32 %v75_v12, %v74_v62  ;;  %v426_v21 = vmul.f32 %v314_v48, %v1274_v4  ;;  %v239_v59 = vld [vmem:[%s1965_s1 + $0x24] sm:$0xff] }
  0x4f   :  { %655 = vmatpush.bf16.xpose.msra.mxu3 %v1436_v35  ;;  %v1490_v45 = vadd.f32 1e-05, %v154_v55  ;;  %v315_v18 = vunpack.c.h.bf16 %v243_v19  ;;  %v322_v23 = vunpack.c.h.bf16 %v247_v20  ;;  %v133_v32 = vadd.f32 %v132_v58, %v131_v25 }
  0x50   :  { %v433_v39 = vmul.f32 %v321_v3, %v1274_v4  ;;  %v141_v41 = vmul.f32 0.125, %v128_v60  ;;  %v148_v48 = vmul.f32 %v1492_v17, %v1492_v17  ;;  %v1508_v19 = vpack.c.bf16 %v431_v52, %v424_v7  ;;  %v235_v3 = vld [vmem:[%s1965_s1 + $0x8] sm:$0xff] }
  0x51   :  { %1115 = vrsqrt.f32 %v1490_v45  ;;  %v77_v20 = vrot.slane %v76_v22, 1  ;;  %v134_v42 = vrot.slane %v133_v32, 1  ;;  %v1510_v44 = vpack.c.bf16 %v432_v43, %v425_v37 }
  0x52   :  { %v298_v49 = vunpack.c.l.bf16 %v234_v0  ;;  %v305_v25 = vunpack.c.l.bf16 %v238_v24  ;;  %v155_v62 = vsub.f32 %v141_v41, %v148_v48  ;;  %v427_v55 = vmul.f32 %v315_v18, %v1285_v14 }
  0x53   :  { %v434_v7 = vmul.f32 %v322_v23, %v1285_v14  ;;  %v78_v61 = vadd.f32 %v77_v20, %v76_v22  ;;  %v135_v9 = vadd.f32 %v134_v42, %v133_v32  ;;  %v1521_v12 = vpack.c.bf16 %v433_v39, %v426_v21 }
  0x54   :  { %617 = vmatpush.bf16.xpose.msra.mxu0 %v1442_v40  ;;  %v299_v52 = vunpack.c.h.bf16 %v234_v0  ;;  %v306_v37 = vunpack.c.h.bf16 %v238_v24  ;;  %v162_v43 = vadd.f32 1e-05, %v155_v62  ;;  %v300_v58 = vunpack.c.l.bf16 %v235_v3 }
  0x55   :  { %630 = vmatpush.bf16.xpose.msra.mxu1 %v1465_v8  ;;  %v307_v60 = vunpack.c.l.bf16 %v239_v59  ;;  %v142_v35 = vmul.f32 0.125, %v135_v9  ;;  %v410_v41 = vmul.f32 %v298_v49, %v1264_v57  ;;  %v417_v18 = vmul.f32 %v305_v25, %v1264_v57 }
  0x56   :  { %643 = vmatpush.bf16.xpose.msra.mxu2 %v1468_v15  ;;  %v1523_v15 = vmul.f32 0.125, %v78_v61  ;;  %1117 = vrsqrt.f32 %v162_v43  ;;  %v1528_v22 = vpack.c.bf16 %v434_v7, %v427_v55  ;;  %v411_v0 = vmul.f32 %v299_v52, %v1270_v63 }
  0x57   :  { %656 = vmatpush.bf16.xpose.msra.mxu3 %v1483_v36  ;;  %v1116_v8 = vpop.eup %1115  ;;  %v418_v24 = vmul.f32 %v306_v37, %v1270_v63  ;;  %v301_v32 = vunpack.c.h.bf16 %v235_v3  ;;  %v308_v39 = vunpack.c.h.bf16 %v239_v59  ;;  %v412_v57 = vmul.f32 %v300_v58, %v1274_v4  ;;  %v292_v63 = vld [vmem:[%s1965_s1 + $0x198] sm:$0xff] }
  0x58   :  { %v205_v21 = vmul.f32 %v1116_v8, %v1490_v45  ;;  %v149_v23 = vmul.f32 %v1523_v15, %v1523_v15  ;;  %v419_v48 = vmul.f32 %v307_v60, %v1274_v4  ;;  %v1539_v49 = vpack.c.bf16 %v417_v18, %v410_v41  ;;  %v296_v3 = vld [vmem:[%s1965_s1 + $0x1b4] sm:$0xff]  ;;  %v284_v60 = vld [vmem:[%s1965_s1 + $0x160] sm:$0xff] }
  0x59   :  { %vm210_vm13 = vweird.f32 %v1490_v45  ;;  %vm211_vm14 = vweird.f32 %v1116_v8  ;;  %v1549_v4 = vpack.c.bf16 %v418_v24, %v411_v0  ;;  %v420_v55 = vmul.f32 %v308_v39, %v1285_v14 }
  0x5a   :  { %v206_v20 = vmul.f32 %v1116_v8, %v205_v21  ;;  %v156_v42 = vsub.f32 %v142_v35, %v149_v23  ;;  %v413_v35 = vmul.f32 %v301_v32, %v1285_v14  ;;  %v1553_v45 = vpack.c.bf16 %v419_v48, %v412_v57  ;;  %vm212_vm15 = vmor %vm210_vm13, %vm211_vm14  ;;  %v288_v14 = vld [vmem:[%s1965_s1 + $0x17c] sm:$0xff] }
  0x5b   :  { %v400_v9 = vunpack.c.l.bf16 %v292_v63  ;;  %v407_v52 = vunpack.c.l.bf16 %v296_v3  ;;  %vm220_vm0 = vweird.f32 %v162_v43  ;;  %v386_v24 = vunpack.c.l.bf16 %v284_v60 }
  0x5c   :  { %618 = vmatpush.bf16.xpose.msra.mxu0 %v1508_v19  ;;  %v207_v25 = vmul.f32 0.5, %v206_v20  ;;  %v163_v59 = vadd.f32 1e-05, %v156_v42  ;;  %v1118_v62 = vpop.eup %1117  ;;  %v1563_v41 = vpack.c.bf16 %v420_v55, %v413_v35  ;;  %v393_v32 = vunpack.c.l.bf16 %v288_v14 }
  0x5d   :  { %631 = vmatpush.bf16.xpose.msra.mxu1 %v1510_v44  ;;  %v215_v61 = vmul.f32 %v1118_v62, %v162_v43  ;;  %vm221_vm1 = vweird.f32 %v1118_v62  ;;  %v401_v20 = vunpack.c.h.bf16 %v292_v63  ;;  %v408_v42 = vunpack.c.h.bf16 %v296_v3 }
  0x5e   :  { %644 = vmatpush.bf16.xpose.msra.mxu2 %v1521_v12  ;;  %v208_v7 = vsub.f32 1.5, %v207_v25  ;;  %1119 = vrsqrt.f32 %v163_v59  ;;  %vm222_vm2 = vmor %vm220_vm0, %vm221_vm1  ;;  %vm230_vm3 = vweird.f32 %v163_v59  ;;  %v387_v63 = vunpack.c.h.bf16 %v284_v60 }
  0x5f   :  { %657 = vmatpush.bf16.xpose.msra.mxu3 %v1528_v22  ;;  %v216_v58 = vmul.f32 %v1118_v62, %v215_v61  ;;  %v394_v3 = vunpack.c.h.bf16 %v288_v14 }
  0x60   :  { %v209_v37 = vmul.f32 %v1116_v8, %v208_v7  ;;  %v276_v7 = vld [vmem:[%s1965_s1 + $0x128] sm:$0xff] }
  0x61   :  { %v217_v21 = vmul.f32 0.5, %v216_v58  ;;  %v293_v58 = vld [vmem:[%s1965_s1 + $0x1a0] sm:$0xf]  ;;  %v372_v60 = vunpack.c.l.bf16 %v276_v7 }
  0x62   :  { %v1566_v18 = vsel %vm212_vm15, %v1116_v8, %v209_v37 }
  0x63   :  { %v512_v23 = vmul.f32 %v400_v9, %v1566_v18  ;;  %v519_v0 = vmul.f32 %v407_v52, %v1566_v18  ;;  %v218_v57 = vsub.f32 1.5, %v217_v21  ;;  %v498_v35 = vmul.f32 %v386_v24, %v1566_v18  ;;  %v289_v24 = vld [vmem:[%s1965_s1 + $0x184] sm:$0xf] }
  0x64   :  { %619 = vmatpush.bf16.xpose.msra.mxu0 %v1539_v49  ;;  %v1120_v39 = vpop.eup %1119  ;;  %v505_v55 = vmul.f32 %v393_v32, %v1566_v18 }
  0x65   :  { %632 = vmatpush.bf16.xpose.msra.mxu1 %v1549_v4  ;;  %v1570_v48 = vpack.c.bf16 %v519_v0, %v512_v23  ;;  %v225_v25 = vmul.f32 %v1120_v39, %v163_v59  ;;  %v219_v8 = vmul.f32 %v1118_v62, %v218_v57  ;;  %vm231_vm4 = vweird.f32 %v1120_v39  ;;  %v285_v0 = vld [vmem:[%s1965_s1 + $0x168] sm:$0xf] }
  0x66   :  { %645 = vmatpush.bf16.xpose.msra.mxu2 %v1553_v45  ;;  %v1595_v23 = vpack.c.bf16 %v505_v55, %v498_v35  ;;  %vm232_vm5 = vmor %vm230_vm3, %vm231_vm4  ;;  %v402_v57 = vunpack.c.l.bf16 %v293_v58  ;;  %v395_v35 = vunpack.c.l.bf16 %v289_v24  ;;  %v484_v59 = vmul.f32 %v372_v60, %v1566_v18  ;;  %v277_v24 = vld [vmem:[%s1965_s1 + $0x130] sm:$0xf] }
  0x67   :  { %658 = vmatpush.bf16.xpose.msra.mxu3 %v1563_v41  ;;  %v226_v43 = vmul.f32 %v1120_v39, %v225_v25  ;;  %v1580_v61 = vsel %vm222_vm2, %v1118_v62, %v219_v8  ;;  %v297_v62 = vld [vmem:[%s1965_s1 + $0x1bc] sm:$0xf] }
  0x68   :  { %v513_v9 = vmul.f32 %v401_v20, %v1580_v61  ;;  %v520_v52 = vmul.f32 %v408_v42, %v1580_v61  ;;  %v409_v20 = vunpack.c.l.bf16 %v297_v62  ;;  %v499_v25 = vmul.f32 %v387_v63, %v1580_v61  ;;  %v268_v63 = vld [vmem:[%s1965_s1 + $0xf0] sm:$0xff] }
  0x69   :  { %v227_v37 = vmul.f32 0.5, %v226_v43  ;;  %v506_v8 = vmul.f32 %v394_v3, %v1580_v61  ;;  %v388_v43 = vunpack.c.l.bf16 %v285_v0  ;;  %v373_v3 = vunpack.c.h.bf16 %v276_v7 }
  0x6a   :  { %v1593_v14 = vpack.c.bf16 %v520_v52, %v513_v9 }
  0x6b   :  { %v228_v21 = vsub.f32 1.5, %v227_v37 }
  0x6c   :  { %664 = vmatpush.bf16.xpose.msrb.mxu0 %v1570_v48 }
  0x6d   :  { %677 = vmatpush.bf16.xpose.msrb.mxu1 %v1593_v14  ;;  %v229_v42 = vmul.f32 %v1120_v39, %v228_v21 }
  0x6f   :  { %709 = vmatpush.bf16.xpose.msrb.mxu3 %v1276_v6  ;;  %v280_v6 = vld [vmem:[%s1965_s1 + $0x144] sm:$0xff]  ;;  %v1608_v55 = vsel %vm232_vm5, %v1120_v39, %v229_v42  ;;  %v1621_v39 = vpack.c.bf16 %v506_v8, %v499_v25  ;;  %v374_v8 = vunpack.c.l.bf16 %v277_v24  ;;  %v273_v24 = vld [vmem:[%s1965_s1 + $0x114] sm:$0xf] }
  0x70   :  { %v379_v32 = vunpack.c.l.bf16 %v280_v6  ;;  %v514_v52 = vmul.f32 %v402_v57, %v1608_v55  ;;  %v521_v37 = vmul.f32 %v409_v20, %v1608_v55  ;;  %v380_v58 = vunpack.c.h.bf16 %v280_v6 }
  0x71   :  { %v500_v60 = vmul.f32 %v388_v43, %v1608_v55  ;;  %v507_v21 = vmul.f32 %v395_v35, %v1608_v55  ;;  %v358_v57 = vunpack.c.l.bf16 %v268_v63  ;;  %v485_v6 = vmul.f32 %v373_v3, %v1580_v61 }
  0x72   :  { %v491_v9 = vmul.f32 %v379_v32, %v1566_v18  ;;  %v577_v62 = vpack.c.bf16 %v521_v37, %v514_v52  ;;  %v281_v32 = vld [vmem:[%s1965_s1 + $0x14c] sm:$0xf]  ;;  %v492_v42 = vmul.f32 %v380_v58, %v1580_v61  ;;  %v260_v52 = vld [vmem:[%s1965_s1 + $0xb8] sm:$0xff] }
  0x73   :  { %v570_v25 = vpack.c.bf16 %v507_v21, %v500_v60  ;;  %v381_v43 = vunpack.c.l.bf16 %v281_v32  ;;  %v470_v35 = vmul.f32 %v358_v57, %v1566_v18  ;;  %v264_v37 = vld [vmem:[%s1965_s1 + $0xd4] sm:$0xff]  ;;  %v344_v32 = vunpack.c.l.bf16 %v260_v52 }
  0x74   :  { %665 = vmatpush.bf16.xpose.msrb.mxu0 %v1595_v23  ;;  %v1625_v0 = vpack.c.bf16 %v491_v9, %v484_v59  ;;  %v1634_v7 = vsel %vm71_vm12, %v577_v62, 0  ;;  %v359_v9 = vunpack.c.h.bf16 %v268_v63  ;;  %v1650_v3 = vpack.c.bf16 %v492_v42, %v485_v6  ;;  %v269_v63 = vld [vmem:[%s1965_s1 + $0xf8] sm:$0xf] }
  0x75   :  { %690 = vmatpush.bf16.xpose.msrb.mxu2 %v1634_v7  ;;  %678 = vmatpush.bf16.xpose.msrb.mxu1 %v1621_v39  ;;  %v486_v62 = vmul.f32 %v374_v8, %v1608_v55  ;;  %v493_v60 = vmul.f32 %v381_v43, %v1608_v55  ;;  %v351_v57 = vunpack.c.l.bf16 %v264_v37  ;;  %v578_v6 = vpack.c.bf16 %v1200_v46, %v1200_v46  ;;  %v256_v46 = vld [vmem:[%s1965_s1 + $0x9c] sm:$0xff] }
  0x76   :  { %v580_v42 = vpack.c.bf16 %v1206_v56, %v1206_v56  ;;  %v360_v8 = vunpack.c.l.bf16 %v269_v63  ;;  %v367_v43 = vunpack.c.l.bf16 %v273_v24 }
  0x77   :  { %710 = vmatpush.bf16.xpose.msrb.mxu3 %v1316_v30  ;;  %v272_v30 = vld [vmem:[%s1965_s1 + $0x10c] sm:$0xff]  ;;  %620 = vmatmul.bf16.vlgmr.msra.gmra.mxu0 %v578_v6 }
  0x78   :  { %v365_v20 = vunpack.c.l.bf16 %v272_v30  ;;  %v366_v58 = vunpack.c.h.bf16 %v272_v30  ;;  %v471_v30 = vmul.f32 %v359_v9, %v1580_v61  ;;  %646 = vmatmul.bf16.vlgmr.msra.gmra.mxu2 %v580_v42  ;;  %v252_v9 = vld [vmem:[%s1965_s1 + $0x80] sm:$0xff]  ;;  %v479_v63 = vmul.f32 %v367_v43, %v1608_v55 }
  0x79   :  { %v581_v42 = vpack.c.bf16 %v1212_v2, %v1212_v2  ;;  %v248_v2 = vld [vmem:[%s1965_s1 + $0x64] sm:$0xff] }
  0x7a   :  { %v477_v59 = vmul.f32 %v365_v20, %v1566_v18  ;;  %v478_v20 = vmul.f32 %v366_v58, %v1580_v61  ;;  %v345_v58 = vunpack.c.h.bf16 %v260_v52  ;;  %v337_v52 = vunpack.c.l.bf16 %v256_v46 }
  0x7b   :  { %659 = vmatmul.bf16.vlgmr.msra.gmra.mxu3 %v581_v42 }
  0x7c   :  { %666 = vmatpush.bf16.xpose.msrb.mxu0 %v1625_v0  ;;  %v1657_v21 = vpack.c.bf16 %v477_v59, %v470_v35  ;;  %v456_v35 = vmul.f32 %v344_v32, %v1566_v18  ;;  %v463_v59 = vmul.f32 %v351_v57, %v1566_v18  ;;  %v1683_v56 = vpack.c.bf16 %v478_v20, %v471_v30  ;;  %v261_v32 = vld [vmem:[%s1965_s1 + $0xc0] sm:$0xf]  ;;  %v265_v57 = vld [vmem:[%s1965_s1 + $0xdc] sm:$0xf] }
  0x7d   :  { %679 = vmatpush.bf16.xpose.msrb.mxu1 %v1650_v3  ;;  %v330_v30 = vunpack.c.l.bf16 %v252_v9  ;;  %v457_v20 = vmul.f32 %v345_v58, %v1580_v61  ;;  %v353_v43 = vunpack.c.l.bf16 %v265_v57 }
  0x7e   :  { %v1690_v24 = vpack.c.bf16 %v463_v59, %v456_v35  ;;  %v449_v35 = vmul.f32 %v337_v52, %v1566_v18  ;;  %v244_v59 = vld [vmem:[%s1965_s1 + $0x48] sm:$0xff]  ;;  %v257_v52 = vld [vmem:[%s1965_s1 + $0xa4] sm:$0xf] }
  0x7f   :  { %711 = vmatpush.bf16.xpose.msrb.mxu3 %v1352_v5  ;;  %v1653_v5 = vsel %vm71_vm12, %v570_v25, 0  ;;  %v563_v25 = vpack.c.bf16 %v493_v60, %v486_v62  ;;  %v472_v60 = vmul.f32 %v360_v8, %v1608_v55  ;;  %v346_v8 = vunpack.c.l.bf16 %v261_v32 }
  0x80   :  { %691 = vmatpush.bf16.xpose.msrb.mxu2 %v1653_v5  ;;  %v465_v32 = vmul.f32 %v353_v43, %v1608_v55 }
  0x81   :  { %v1686_v62 = vsel %vm71_vm12, %v563_v25, 0  ;;  %v556_v25 = vpack.c.bf16 %v479_v63, %v472_v60  ;;  %v458_v63 = vmul.f32 %v346_v8, %v1608_v55 }
  0x83   :  { %v1719_v60 = vsel %vm71_vm12, %v556_v25, 0  ;;  %v339_v25 = vunpack.c.l.bf16 %v257_v52 }
  0x84   :  { %667 = vmatpush.bf16.xpose.msrb.mxu0 %v1657_v21  ;;  %1991 = vst [vmem:[#allocation12_spill] sm:$0xff] %v1719_v60 }
  0x85   :  { %680 = vmatpush.bf16.xpose.msrb.mxu1 %v1683_v56 }
  0x87   :  { %712 = vmatpush.bf16.xpose.msrb.mxu3 %v1392_v47  ;;  %v352_v47 = vunpack.c.h.bf16 %v264_v37  ;;  %v579_v37 = vpack.c.bf16 %v1202_v50, %v1202_v50  ;;  %v442_v50 = vmul.f32 %v330_v30, %v1566_v18  ;;  %v253_v30 = vld [vmem:[%s1965_s1 + $0x88] sm:$0xf] }
  0x88   :  { %692 = vmatpush.bf16.xpose.msrb.mxu2 %v1686_v62  ;;  %v332_v42 = vunpack.c.l.bf16 %v253_v30  ;;  %v451_v30 = vmul.f32 %v339_v25, %v1608_v55 }
  0x89   :  { %v464_v6 = vmul.f32 %v352_v47, %v1580_v61  ;;  %633 = vmatmul.bf16.vlgmr.msra.gmra.mxu1 %v579_v37  ;;  %v331_v47 = vunpack.c.h.bf16 %v252_v9  ;;  %v1723_v57 = vpack.c.bf16 %v449_v35, %v442_v50  ;;  %v316_v37 = vunpack.c.l.bf16 %v244_v59  ;;  %v236_v50 = vld [vmem:[%s1965_s1 + $0x10] sm:$0xff] }
  0x8a   :  { %v323_v9 = vunpack.c.l.bf16 %v248_v2  ;;  %v240_v35 = vld [vmem:[%s1965_s1 + $0x2c] sm:$0xff] }
  0x8b   :  { %v1716_v58 = vpack.c.bf16 %v464_v6, %v457_v20  ;;  %v549_v6 = vpack.c.bf16 %v465_v32, %v458_v63  ;;  %v428_v8 = vmul.f32 %v316_v37, %v1566_v18  ;;  %v324_v63 = vunpack.c.h.bf16 %v248_v2  ;;  %v245_v37 = vld [vmem:[%s1965_s1 + $0x50] sm:$0xf] }
  0x8c   :  { %668 = vmatpush.bf16.xpose.msrb.mxu0 %v1690_v24  ;;  %v435_v43 = vmul.f32 %v323_v9, %v1566_v18  ;;  %v444_v32 = vmul.f32 %v332_v42, %v1608_v55  ;;  %v249_v9 = vld [vmem:[%s1965_s1 + $0x6c] sm:$0xf]  ;;  %v318_v42 = vunpack.c.l.bf16 %v245_v37 }
  0x8d   :  { %1990 = vst [vmem:[#allocation11_spill] sm:$0xff] %v1716_v58  ;;  %681 = vmatpush.bf16.xpose.msrb.mxu1 %v1716_v58  ;;  %v325_v25 = vunpack.c.l.bf16 %v249_v9 }
  0x8e   :  { %v1752_v52 = vpack.c.bf16 %v435_v43, %v428_v8 }
  0x8f   :  { %713 = vmatpush.bf16.xpose.msrb.mxu3 %v1427_v28  ;;  %v338_v28 = vunpack.c.h.bf16 %v256_v46  ;;  %v443_v46 = vmul.f32 %v331_v47, %v1580_v61 }
  0x90   :  { %693 = vmatpush.bf16.xpose.msrb.mxu2 %v1719_v60  ;;  %v310_v60 = vunpack.c.h.bf16 %v240_v35 }
  0x91   :  { %v450_v20 = vmul.f32 %v338_v28, %v1580_v61  ;;  %v317_v28 = vunpack.c.h.bf16 %v244_v59  ;;  %v309_v59 = vunpack.c.l.bf16 %v240_v35 }
  0x92   :  { %v422_v35 = vmul.f32 %v310_v60, %v1580_v61 }
  0x93   :  { %v1745_v47 = vpack.c.bf16 %v450_v20, %v443_v46  ;;  %v302_v46 = vunpack.c.l.bf16 %v236_v50  ;;  %v429_v2 = vmul.f32 %v317_v28, %v1580_v61  ;;  %v436_v20 = vmul.f32 %v324_v63, %v1580_v61 }
  0x94   :  { %669 = vmatpush.bf16.xpose.msrb.mxu0 %v1723_v57  ;;  %v421_v43 = vmul.f32 %v309_v59, %v1566_v18  ;;  %v430_v28 = vmul.f32 %v318_v42, %v1608_v55  ;;  %v437_v63 = vmul.f32 %v325_v25, %v1608_v55  ;;  %v703_v42 = vld [vmem:[%s1968_s4] sm:$0x1] }
  0x95   :  { %1992 = vst [vmem:[#allocation13_spill] sm:$0xff] %v1745_v47  ;;  %682 = vmatpush.bf16.xpose.msrb.mxu1 %v1745_v47  ;;  %v414_v8 = vmul.f32 %v302_v46, %v1566_v18  ;;  %v1768_v58 = vpack.c.bf16 %v436_v20, %v429_v2  ;;  %v241_v18 = vld [vmem:[%s1965_s1 + $0x34] sm:$0xf] }
  0x96   :  { %v311_v9 = vunpack.c.l.bf16 %v241_v18 }
  0x97   :  { %714 = vmatpush.bf16.xpose.msrb.mxu3 %v1442_v40  ;;  %v1748_v40 = vsel %vm71_vm12, %v549_v6, 0  ;;  %v542_v6 = vpack.c.bf16 %v451_v30, %v444_v32  ;;  %v526_v32 = vpack.c.bf16 %v421_v43, %v414_v8  ;;  %v535_v30 = vpack.c.bf16 %v437_v63, %v430_v28 }
  0x98   :  { %1993 = vst [vmem:[#allocation14_spill] sm:$0xff] %v1748_v40  ;;  %694 = vmatpush.bf16.xpose.msrb.mxu2 %v1748_v40  ;;  %v303_v40 = vunpack.c.h.bf16 %v236_v50 }
  0x99   :  { %v1771_v47 = vsel %vm71_vm12, %v542_v6, 0  ;;  %v1791_v59 = vsel %vm71_vm12, %v535_v30, 0 }
  0x9a   :  { %v415_v50 = vmul.f32 %v303_v40, %v1580_v61  ;;  %v423_v40 = vmul.f32 %v311_v9, %v1608_v55  ;;  %v582_v61 = vpack.c.bf16 %v1461_v1, %v1461_v1 }
  0x9c   :  { %670 = vmatpush.bf16.xpose.msrb.mxu0 %v1752_v52  ;;  %v1788_v46 = vpack.c.bf16 %v422_v35, %v415_v50 }
  0x9d   :  { %683 = vmatpush.bf16.xpose.msrb.mxu1 %v1768_v58 }
  0x9f   :  { %715 = vmatpush.bf16.xpose.msrb.mxu3 %v1508_v19  ;;  %v237_v19 = vld [vmem:[%s1965_s1 + $0x18] sm:$0xf] }
  0xa0   :  { %695 = vmatpush.bf16.xpose.msrb.mxu2 %v1771_v47  ;;  %v304_v37 = vunpack.c.l.bf16 %v237_v19 }
  0xa2   :  { %v416_v2 = vmul.f32 %v304_v37, %v1608_v55 }
  0xa4   :  { %671 = vmatpush.bf16.xpose.msrb.mxu0 %v526_v32 }
  0xa5   :  { %684 = vmatpush.bf16.xpose.msrb.mxu1 %v1788_v46 }
  0xa7   :  { %716 = vmatpush.bf16.xpose.msrb.mxu3 %v1539_v49  ;;  %v1127_v49 = vld [vmem:[%s1964_s0] sm:$0xff] }
  0xa8   :  { %v28_v60 = vpack.c.bf16 %v1127_v49, %v1127_v49  ;;  %696 = vmatpush.bf16.xpose.msrb.mxu2 %v1791_v59 }
  0xab   :  { %672 = vmatmul.bf16.vlgmr.msrb.gmra.mxu0 %v582_v61 }
  0xac   :  { %722 = vmatpush.bf16.xpose.msra.mxu0 %v1280_v10  ;;  %v528_v10 = vpack.c.bf16 %v423_v40, %v416_v2 }
  0xad   :  { %735 = vmatpush.bf16.xpose.msra.mxu1 %v1283_v13  ;;  %v584_v13 = vpack.c.bf16 %v1523_v15, %v1523_v15  ;;  %v1999_v15 = vld [vmem:[#allocation11_spill] sm:$0xff] }
  0xae   :  { %717 = vmatmul.bf16.vlgmr.msrb.gmra.mxu3 %v28_v60  ;;  %v1808_v1 = vsel %vm71_vm12, %v528_v10, 0 }
  0xaf   :  { %761 = vmatpush.bf16.xpose.msra.mxu3 %v1570_v48  ;;  %v583_v48 = vpack.c.bf16 %v1492_v17, %v1492_v17  ;;  %v2000_v17 = vld [vmem:[#allocation14_spill] sm:$0xff] }
  0xb0   :  { %697 = vmatpush.bf16.xpose.msrb.mxu2 %v1808_v1 }
  0xb1   :  { %685 = vmatmul.bf16.vlgmr.msrb.gmra.mxu1 %v583_v48 }
  0xb4   :  { %723 = vmatpush.bf16.xpose.msra.mxu0 %v1319_v34  ;;  %v1995_v34 = vld [vmem:[#allocation7_spill] sm:$0xff] }
  0xb5   :  { %736 = vmatpush.bf16.xpose.msra.mxu1 %v1324_v38  ;;  %v1996_v38 = vld [vmem:[#allocation10_spill] sm:$0xff] }
  0xb7   :  { %762 = vmatpush.bf16.xpose.msra.mxu3 %v1595_v23  ;;  %1024 = vmatmul.msk.bf16.vlgmr.msrb.gmra.mxu2 %vm71_vm12, %v584_v13 }
  0xb8   :  { %748 = vmatpush.bf16.xpose.msra.mxu2 %v1308_v26  ;;  %v1994_v26 = vld [vmem:[#allocation9_spill] sm:$0xff] }
  0xbc   :  { %724 = vmatpush.bf16.xpose.msra.mxu0 %v1357_v11 }
  0xbd   :  { %737 = vmatpush.bf16.xpose.msra.mxu1 %v1362_v16  ;;  %v1997_v16 = vld [vmem:[#allocation5_spill] sm:$0xff] }
  0xbf   :  { %763 = vmatpush.bf16.xpose.msra.mxu3 %v1625_v0 }
  0xc0   :  { %749 = vmatpush.bf16.xpose.msra.mxu2 %v1341_v51  ;;  %v1128_v51 = vld [vmem:[%s1964_s0 + $0x8] sm:$0xff] }
  0xc1   :  { %v29_v11 = vpack.c.bf16 %v1128_v51, %v1128_v51 }
  0xc4   :  { %725 = vmatpush.bf16.xpose.msra.mxu0 %v1395_v53  ;;  %v1129_v53 = vld [vmem:[%s1964_s0 + $0x10] sm:$0xff] }
  0xc5   :  { %738 = vmatpush.bf16.xpose.msra.mxu1 %v1397_v54  ;;  %v30_v54 = vpack.c.bf16 %v1129_v53, %v1129_v53 }
  0xc7   :  { %764 = vmatpush.bf16.xpose.msra.mxu3 %v1657_v21 }
  0xc8   :  { %750 = vmatpush.bf16.xpose.msra.mxu2 %v1380_v29  ;;  %v32_v29 = vpack.c.bf16 %v1997_v16, %v1997_v16 }
  0xcc   :  { %726 = vmatpush.bf16.xpose.msra.mxu0 %v1429_v31 }
  0xcd   :  { %739 = vmatpush.bf16.xpose.msra.mxu1 %v1434_v33  ;;  %v1998_v33 = vld [vmem:[#allocation12_spill] sm:$0xff] }
  0xcf   :  { %765 = vmatpush.bf16.xpose.msra.mxu3 %v1690_v24 }
  0xd0   :  { %751 = vmatpush.bf16.xpose.msra.mxu2 %v1425_v27  ;;  %v1130_v27 = vld [vmem:[%s1964_s0 + $0x18] sm:$0xff] }
  0xd1   :  { %v31_v31 = vpack.c.bf16 %v1130_v27, %v1130_v27 }
  0xd4   :  { %727 = vmatpush.bf16.xpose.msra.mxu0 %v1994_v26 }
  0xd5   :  { %740 = vmatpush.bf16.xpose.msra.mxu1 %v1996_v38 }
  0xd7   :  { %766 = vmatpush.bf16.xpose.msra.mxu3 %v1723_v57 }
  0xd8   :  { %752 = vmatpush.bf16.xpose.msra.mxu2 %v1995_v34 }
  0xdc   :  { %728 = vmatpush.bf16.xpose.msra.mxu0 %v1510_v44  ;;  %v2001_v44 = vld [vmem:[#allocation13_spill] sm:$0xff] }
  0xdd   :  { %741 = vmatpush.bf16.xpose.msra.mxu1 %v1521_v12 }
  0xdf   :  { %767 = vmatpush.bf16.xpose.msra.mxu3 %v1752_v52 }
  0xe0   :  { %753 = vmatpush.bf16.xpose.msra.mxu2 %v1483_v36 }
  0xe4   :  { %729 = vmatpush.bf16.xpose.msra.mxu0 %v1549_v4 }
  0xe5   :  { %742 = vmatpush.bf16.xpose.msra.mxu1 %v1553_v45 }
  0xe7   :  { %768 = vmatpush.bf16.xpose.msra.mxu3 %v526_v32 }
  0xe8   :  { %754 = vmatpush.bf16.xpose.msra.mxu2 %v1528_v22 }
  0xeb   :  { %730 = vmatmul.bf16.vlgmr.msra.gmra.mxu0 %v29_v11 }
  0xec   :  { %774 = vmatpush.bf16.xpose.msrb.mxu0 %v1593_v14  ;;  %743 = vmatmul.bf16.vlgmr.msra.gmra.mxu1 %v30_v54 }
  0xed   :  { %787 = vmatpush.bf16.xpose.msrb.mxu1 %v1634_v7  ;;  %v2002_v7 = vld [vmem:[#allocation6_spill] sm:$0xff] }
  0xee   :  { %769 = vmatmul.bf16.vlgmr.msra.gmra.mxu3 %v32_v29 }
  0xf0   :  { %755 = vmatpush.bf16.xpose.msra.mxu2 %v1563_v41 }
  0xf4   :  { %775 = vmatpush.bf16.xpose.msrb.mxu0 %v1621_v39  ;;  %v621_v36 = vpop.f32.mrf.mxu0 }
  0xf5   :  { %788 = vmatpush.bf16.xpose.msrb.mxu1 %v1653_v5  ;;  %v2003_v5 = vld [vmem:[#allocation8_spill] sm:$0xff] }
  0xf6   :  { %v34_v21 = vpack.c.bf16 %v2003_v5, %v2003_v5  ;;  %v1103_v5 = vld [vmem:[%s1966_s2 + $0x30] sm:$0xff]  }
  0xf7   :  { %756 = vmatmul.bf16.vlgmr.msra.gmra.mxu2 %v31_v31 }
  0xfb   :  { %v647_v12 = vpop.f32.mrf.mxu2 }
  0xfc   :  { %776 = vmatpush.bf16.xpose.msrb.mxu0 %v1650_v3  ;;  %v623_v45 = vpop.f32.mrf.mxu0  ;;  %v33_v3 = vpack.c.bf16 %v2002_v7, %v2002_v7 }
  0xfd   :  { %789 = vmatpush.bf16.xpose.msrb.mxu1 %v1686_v62 }
  0xfe   :  { %v660_v14 = vpop.f32.mrf.mxu3 }
 0x103   :  { %v649_v23 = vpop.f32.mrf.mxu2 }
 0x104   :  { %777 = vmatpush.bf16.xpose.msrb.mxu0 %v1683_v56  ;;  %v1104_v23 = vld [vmem:[%s1966_s2 + $0x38] sm:$0xff]  }
 0x105   :  { %790 = vmatpush.bf16.xpose.msrb.mxu1 %v1998_v33 }
 0x106   :  { %v634_v22 = vpop.f32.mrf.mxu1  ;;  %v662_v0 = vpop.f32.mrf.mxu3 }
 0x107   :  { %v635_v4 = vadd.f32 %v634_v22, %v621_v36  ;;  %v1097_v0 = vunpack.c.h.bf16 %v1104_v23 }
 0x109   :  { %v648_v41 = vadd.f32 %v647_v12, %v635_v4 }
 0x10b   :  { %v661_v39 = vadd.f32 %v660_v14, %v648_v41 }
 0x10c   :  { %778 = vmatpush.bf16.xpose.msrb.mxu0 %v1999_v15 }
 0x10d   :  { %791 = vmatpush.bf16.xpose.msrb.mxu1 %v2000_v17 }
 0x10e   :  { %v636_v55 = vpop.f32.mrf.mxu1 }
 0x114   :  { %779 = vmatpush.bf16.xpose.msrb.mxu0 %v2001_v44 }
 0x115   :  { %792 = vmatpush.bf16.xpose.msrb.mxu1 %v1771_v47 }
 0x11c   :  { %780 = vmatpush.bf16.xpose.msrb.mxu0 %v1768_v58 }
 0x11d   :  { %793 = vmatpush.bf16.xpose.msrb.mxu1 %v1791_v59 }
 0x124   :  { %781 = vmatpush.bf16.xpose.msrb.mxu0 %v1788_v46 }
 0x125   :  { %794 = vmatpush.bf16.xpose.msrb.mxu1 %v1808_v1 }
 0x128   :  { %v673_v56 = vpop.f32.mrf.mxu0 }
 0x129   :  { %v674_v62 = vadd.f32 %v673_v56, %v661_v39  ;;  %v1096_v39 = vunpack.c.l.bf16 %v1104_v23 }
 0x12b   :  { %782 = vmatmul.bf16.vlgmr.msrb.gmra.mxu0 %v33_v3 }
 0x12c   :  { %1025 = vmatmul.msk.bf16.vlgmr.msrb.gmra.mxu1 %vm71_vm12, %v34_v21 }
 0x12e   :  { %v686_v24 = vpop.f32.mrf.mxu1 }
 0x12f   :  { %v687_v58 = vadd.f32 %v686_v24, %v674_v62  ;;  %v1092_v24 = vunpack.c.l.bf16 %v1103_v5 }
 0x130   :  { %v675_v47 = vpop.f32.mrf.mxu0 }
 0x131   :  { %v718_v57 = vpop.f32.mrf.mxu3 }
 0x136   :  { %v688_v52 = vpop.f32.mrf.mxu1 }
 0x137   :  { %v1102_v52 = vld [vmem:[%s1966_s2 + $0x28] sm:$0xff]  }
 0x139   :  { %v720_v20 = vpop.f32.mrf.mxu3 }
 0x13a   :  { %v699_v6 = vpop.f32.mrf.mxu2 }
 0x13b   :  { %v700_v25 = vadd.f32 %v699_v6, %v687_v58  ;;  %v1093_v58 = vunpack.c.h.bf16 %v1103_v5  ;;  %v1088_v6 = vunpack.c.l.bf16 %v1102_v52 }
 0x13d   :  { %v704_v8 = vsub.f32 %v703_v42, %v700_v25  ;;  %v1089_v42 = vunpack.c.h.bf16 %v1102_v52 }
 0x13f   :  { %v705_v43 = vperm.slane %v704_v8, 0 }
 0x141   :  { %v719_v28 = vadd.f32 %v718_v57, %v705_v43  ;;  %v1101_v43 = vld [vmem:[%s1966_s2 + $0x20] sm:$0xff]  }
 0x142   :  { %v701_v63 = vpop.f32.mrf.mxu2 }
 0x143   :  { %v1084_v63 = vunpack.c.l.bf16 %v1101_v43 }
 0x168   :  { %v731_v32 = vpop.f32.mrf.mxu0 }
 0x169   :  { %v744_v19 = vpop.f32.mrf.mxu1  ;;  %v732_v46 = vadd.f32 %v731_v32, %v719_v28  ;;  %v1085_v32 = vunpack.c.h.bf16 %v1101_v43 }
 0x16b   :  { %v745_v59 = vadd.f32 %v744_v19, %v732_v46 }
 0x170   :  { %v733_v50 = vpop.f32.mrf.mxu0 }
 0x171   :  { %v770_v18 = vpop.f32.mrf.mxu3  ;;  %v746_v35 = vpop.f32.mrf.mxu1  ;;  %v1100_v50 = vld [vmem:[%s1966_s2 + $0x18] sm:$0xff]  }
 0x179   :  { %v772_v30 = vpop.f32.mrf.mxu3 }
 0x17a   :  { %v757_v37 = vpop.f32.mrf.mxu2  ;;  %v1080_v30 = vunpack.c.l.bf16 %v1100_v50 }
 0x17b   :  { %v758_v2 = vadd.f32 %v757_v37, %v745_v59  ;;  %v1081_v37 = vunpack.c.h.bf16 %v1100_v50  ;;  %v1099_v59 = vld [vmem:[%s1966_s2 + $0x10] sm:$0xff]  }
 0x17d   :  { %v771_v61 = vadd.f32 %v770_v18, %v758_v2 }
 0x182   :  { %v759_v9 = vpop.f32.mrf.mxu2 }
 0x1a8   :  { %v783_v40 = vpop.f32.mrf.mxu0 }
 0x1a9   :  { %v784_v49 = vadd.f32 %v783_v40, %v771_v61  ;;  %v796_v60 = vpop.f32.mrf.mxu1  ;;  %v1076_v40 = vunpack.c.l.bf16 %v1099_v59  ;;  %v1077_v61 = vunpack.c.h.bf16 %v1099_v59 }
 0x1ab   :  { %v797_v10 = vadd.f32 %v796_v60, %v784_v49  ;;  %v1065_v49 = vld [vmem:[%s1967_s3 + $0x38] sm:$0xff]  ;;  %v1064_v60 = vld [vmem:[%s1967_s3 + $0x30] sm:$0xff] }
 0x1ac   :  { %984 = vmatpush.bf16.msra.mxu0 %v1065_v49 }
 0x1ad   :  { %v1875_v1 = vmax.f32 %v797_v10, 0.0 }
 0x1af   :  { %v801_v13 = vrot.slane %v1875_v1, 4  ;;  %v808_v26 = vmul.f32 %v1875_v1, %v1875_v1 }
 0x1b0   :  { %v785_v48 = vpop.f32.mrf.mxu0  ;;  %985 = vmatpush.bf16.msra.mxu0 %v1064_v60 }
 0x1b1   :  { %v802_v34 = vadd.f32 %v801_v13, %v1875_v1  ;;  %v809_v38 = vrot.slane %v808_v26, 4  ;;  %v798_v51 = vpop.f32.mrf.mxu1  ;;  %v1098_v13 = vld [vmem:[%s1966_s2 + $0x8] sm:$0xff]  }
 0x1b2   :  { %v1073_v51 = vunpack.c.h.bf16 %v1098_v13 }
 0x1b3   :  { %v803_v11 = vrot.slane %v802_v34, 2  ;;  %v810_v16 = vadd.f32 %v809_v38, %v808_v26  ;;  %v1063_v26 = vld [vmem:[%s1967_s3 + $0x28] sm:$0xff]  ;;  %v1072_v38 = vunpack.c.l.bf16 %v1098_v13 }
 0x1b4   :  { %986 = vmatpush.bf16.msra.mxu0 %v1063_v26 }
 0x1b5   :  { %v804_v29 = vadd.f32 %v803_v11, %v802_v34  ;;  %v811_v53 = vrot.slane %v810_v16, 2  ;;  %v1062_v11 = vld [vmem:[%s1967_s3 + $0x20] sm:$0xff] }
 0x1b7   :  { %v805_v54 = vrot.slane %v804_v29, 1  ;;  %v812_v27 = vadd.f32 %v811_v53, %v810_v16  ;;  %v1067_v53 = vld [vmem:[%s1966_s2] sm:$0xff]  }
 0x1b8   :  { %987 = vmatpush.bf16.msra.mxu0 %v1062_v11 }
 0x1b9   :  { %v806_v31 = vadd.f32 %v805_v54, %v804_v29  ;;  %v813_v33 = vrot.slane %v812_v27, 1  ;;  %v1061_v54 = vld [vmem:[%s1967_s3 + $0x18] sm:$0xff] }
 0x1bb   :  { %v1881_v15 = vmul.f32 0.125, %v806_v31  ;;  %v814_v36 = vadd.f32 %v813_v33, %v812_v27  ;;  %v1068_v31 = vunpack.c.l.bf16 %v1067_v53  ;;  %v1069_v33 = vunpack.c.h.bf16 %v1067_v53 }
 0x1bc   :  { %988 = vmatpush.bf16.msra.mxu0 %v1061_v54 }
 0x1bd   :  { %v815_v17 = vmul.f32 0.125, %v814_v36  ;;  %v816_v44 = vmul.f32 %v1881_v15, %v1881_v15 }
 0x1bf   :  { %v817_v12 = vsub.f32 %v815_v17, %v816_v44 }
 0x1c1   :  { %v818_v22 = vadd.f32 1e-05, %v817_v12  ;;  %v885_v12 = vpack.c.bf16 %v1881_v15, %v1881_v15 }
 0x1c3   :  { %1121 = vrsqrt.f32 %v818_v22  ;;  %vm825_vm7 = vweird.f32 %v818_v22 }
 0x1c9   :  { %v1122_v4 = vpop.eup %1121 }
 0x1ca   :  { %v820_v45 = vmul.f32 %v1122_v4, %v818_v22  ;;  %vm826_vm6 = vweird.f32 %v1122_v4  ;;  %v899_v22 = vpack.c.bf16 %v1875_v1, %v1875_v1  ;;  %v900_v1 = vld [vmem:[%s1968_s4 + $0x1] sm:$0x1] }
 0x1cb   :  { %vm827_vm8 = vmor %vm825_vm7, %vm826_vm6 }
 0x1cc   :  { %v821_v41 = vmul.f32 %v1122_v4, %v820_v45  ;;  %v1059_v45 = vld [vmem:[%s1967_s3 + $0x8] sm:$0xff] }
 0x1ce   :  { %v822_v14 = vmul.f32 0.5, %v821_v41  ;;  %v1058_v41 = vld [vmem:[%s1967_s3] sm:$0xff] }
 0x1d0   :  { %v823_v55 = vsub.f32 1.5, %v822_v14 }
 0x1d2   :  { %v824_v7 = vmul.f32 %v1122_v4, %v823_v55 }
 0x1d4   :  { %v1888_v3 = vsel %vm827_vm8, %v1122_v4, %v824_v7  ;;  %v1060_v4 = vld [vmem:[%s1967_s3 + $0x10] sm:$0xff]  ;;  %s1157_s3 = smov [#allocation2]  }
 0x1d5   :  { %v875_v21 = vmul.f32 %v1096_v39, %v1888_v3  ;;  %v876_v56 = vmul.f32 %v1097_v0, %v1888_v3  ;;  %v873_v57 = vmul.f32 %v1092_v24, %v1888_v3  ;;  %v874_v47 = vmul.f32 %v1093_v58, %v1888_v3  ;;  %989 = vmatpush.bf16.msra.mxu0 %v1060_v4  ;;  %s1013_s26 = sshll.u32 %s1157_s3, 4  ;;  %s1014_s26 = int_to_ptr.vmem [resolvable:$true] %s1013_s26 }
 0x1d6   :  { %v871_v25 = vmul.f32 %v1088_v6, %v1888_v3  ;;  %v872_v8 = vmul.f32 %v1089_v42, %v1888_v3  ;;  %v869_v19 = vmul.f32 %v1084_v63, %v1888_v3  ;;  %v870_v18 = vmul.f32 %v1085_v32, %v1888_v3 }
 0x1d7   :  { %v884_v62 = vpack.c.bf16 %v876_v56, %v875_v21  ;;  %v883_v20 = vpack.c.bf16 %v874_v47, %v873_v57  ;;  %v867_v9 = vmul.f32 %v1080_v30, %v1888_v3  ;;  %v868_v46 = vmul.f32 %v1081_v37, %v1888_v3  ;;  %v1106_v21 = vld [vmem:[%s1968_s4 + $0x2] ss:$0 sm:$0xff] }
 0x1d8   :  { %v882_v28 = vpack.c.bf16 %v872_v8, %v871_v25  ;;  %v881_v35 = vpack.c.bf16 %v870_v18, %v869_v19  ;;  %v865_v10 = vmul.f32 %v1076_v40, %v1888_v3  ;;  %v866_v48 = vmul.f32 %v1077_v61, %v1888_v3 }
 0x1d9   :  { %886 = vmatpush.bf16.xpose.msrb.mxu2 %v884_v62  ;;  %903 = vmatpush.bf16.xpose.msrb.mxu3 %v884_v62  ;;  %v880_v2 = vpack.c.bf16 %v868_v46, %v867_v9  ;;  %v863_v16 = vmul.f32 %v1072_v38, %v1888_v3  ;;  %v864_v29 = vmul.f32 %v1073_v51, %v1888_v3 }
 0x1da   :  { %v879_v34 = vpack.c.bf16 %v866_v48, %v865_v10  ;;  %v861_v36 = vmul.f32 %v1068_v31, %v1888_v3  ;;  %v862_v17 = vmul.f32 %v1069_v33, %v1888_v3  ;;  %990 = vmatpush.bf16.msra.mxu0 %v1059_v45 }
 0x1db   :  { %v878_v27 = vpack.c.bf16 %v864_v29, %v863_v16 }
 0x1dc   :  { %v877_v44 = vpack.c.bf16 %v862_v17, %v861_v36 }
 0x1de   :  { %991 = vmatpush.bf16.msra.mxu0 %v1058_v41 }
 0x1e1   :  { %887 = vmatpush.bf16.xpose.msrb.mxu2 %v883_v20  ;;  %904 = vmatpush.bf16.xpose.msrb.mxu3 %v883_v20 }
 0x1e9   :  { %888 = vmatpush.bf16.xpose.msrb.mxu2 %v882_v28  ;;  %905 = vmatpush.bf16.xpose.msrb.mxu3 %v882_v28 }
 0x1f1   :  { %889 = vmatpush.bf16.xpose.msrb.mxu2 %v881_v35  ;;  %906 = vmatpush.bf16.xpose.msrb.mxu3 %v881_v35 }
 0x1f9   :  { %890 = vmatpush.bf16.xpose.msrb.mxu2 %v880_v2  ;;  %907 = vmatpush.bf16.xpose.msrb.mxu3 %v880_v2 }
 0x201   :  { %891 = vmatpush.bf16.xpose.msrb.mxu2 %v879_v34  ;;  %908 = vmatpush.bf16.xpose.msrb.mxu3 %v879_v34 }
 0x209   :  { %892 = vmatpush.bf16.xpose.msrb.mxu2 %v878_v27  ;;  %909 = vmatpush.bf16.xpose.msrb.mxu3 %v878_v27 }
 0x211   :  { %893 = vmatpush.bf16.xpose.msrb.mxu2 %v877_v44  ;;  %910 = vmatpush.bf16.xpose.msrb.mxu3 %v877_v44 }
 0x218   :  { %894 = vmatmul.bf16.vlgmr.msrb.gmra.mxu2 %v885_v12  ;;  %911 = vmatmul.bf16.vlgmr.msrb.gmra.mxu3 %v899_v22 }
 0x29b   :  { %v895_v15 = vpop.f32.mrf.mxu2  ;;  %v912_v14 = vpop.f32.mrf.mxu3 }
 0x29c   :  { %v901_v23 = vsub.f32 %v900_v1, %v895_v15 }
 0x29e   :  { %v902_v55 = vperm.slane %v901_v23, 0 }
 0x2a0   :  { %v913_v39 = vadd.f32 %v912_v14, %v902_v55 }
 0x2a2   :  { %v916_v0 = vmax.f32 %v913_v39, 0.0 }
 0x2a3   :  { %v897_v7 = vpop.f32.mrf.mxu2  ;;  %v914_v3 = vpop.f32.mrf.mxu3 }
 0x2a4   :  { %v917_v5 = vpack.c.bf16 %v916_v0, %v916_v0 }
 0x2a6   :  { %992 = vmatmul.bf16.vlgmr.msra.gmra.mxu0 %v917_v5 }
 0x323   :  { %v993_v56 = vpop.f32.mrf.mxu0 }
 0x324   :  { %v994_v62 = vadd.f32 %v1106_v21, %v993_v56 }
 0x326   :  { %997 = vmax.xlane.f32.xlu0 %v994_v62 }
 0x32b   :  { %v995_v24 = vpop.f32.mrf.mxu0 }
 0x399   :  { %v998_v58 = vpop.xlane.xlu0 %997 }
 0x39a   :  { %v999_v57 = vsub.f32 %v994_v62, %v998_v58 }
 0x39c   :  { %v1000_v47 = vmul.f32 1.442695, %v999_v57 }
 0x39e   :  { %1123 = vpow2.f32 %v1000_v47 }
 0x3a4   :  { %v1124_v52 = vpop.eup %1123 }
 0x3a5   :  { %1002 = vadd.xlane.f32.xlu0 %v1124_v52 }
 0x418   :  { %v1003_v20 = vpop.xlane.xlu0 %1002 }
 0x419   :  { %1125 = vlog2.f32 %v1003_v20 }
 0x41f   :  { %v1126_v6 = vpop.eup %1125 }
 0x420   :  { %v1005_v42 = vmul.f32 0.6931472, %v1126_v6 }
 0x422   :  { %v1006_v25 = vsub.f32 %v999_v57, %v1005_v42 }
 0x424   :  { %1007 = vst [vmem:[#allocation2] sm:$0xff] %v1006_v25 }
 0x425   :  { %1018 = dma.vmem_to_hbm [thread:$0]  %s1014_s26, 128, %s1016_s29, [#allocation3]  }
 0x426   :  { %1155 = dma.done.wait [#allocation3], 128  }
 0x427   :  { %1156 = vsyncadd [#allocation3], 4294967168 }
 0x428   :  { %1023 = vsyncpa [#allocation3], 1 }

</bundles_post_ra>
